<compile_context>
chip_gen: v7x
topology: tpu7x:2x2x1
jax: 0.10.0
libtpu: 0.0.40
codegen_flags: <defaults>
</compile_context>

<pallas_src>
import functools

import jax
import jax.numpy as jnp
from jax import lax
from jax.experimental import pallas as pl
from jax.experimental.pallas import tpu as pltpu


def _round_up(v, m):
    return ((v + m - 1) // m) * m


def _fused_lstm_fc_kernel(x_ref, wih_ref, whh_ref, bias_ref, wfc_ref, bfc_ref,
                          out_ref, *, seq_len, num_points, fused_hidden):
    """One batch-block: all spatial points fused via block-diagonal weights.

    x_ref    : (S, Bb, N)      time-major input block, f32
    wih_ref  : (N, 4*NH)       per-point input->gate rows (gate-major cols), f32
    whh_ref  : (NH, 4*NH)      block-diagonal hidden->gates, bf16 (weight-resident)
    bias_ref : (1, 4*NH)       combined b_ih + b_hh, gate-major, f32
    wfc_ref  : (NH, OUT_PAD)   block-diagonal FC weights, lane-padded to 128, f32
    bfc_ref  : (1, OUT_PAD)    FC bias, lane-padded, f32
    out_ref  : (Bb, OUT_PAD)   lane-dense output slab
    """
    S, N, NH = seq_len, num_points, fused_hidden
    G = 4 * NH
    Bb = out_ref.shape[0]

    x = x_ref[...]                       # (S, Bb, N) f32
    wih = wih_ref[...]                   # (N, G)
    whh_bf = whh_ref[...]                # (NH, G) bf16, loaded once -> loop-invariant
    # TODO(synk): if a bundle dump shows Mosaic re-pushing the W_hh RHS each
    # timestep, switch to explicit weight-stationary MXU driving
    # (pltpu.matmul_push_rhs once, matmul_acc_lhs / matmul_pop per step).

    # Hoisted input->gate contribution (+ bias) for ALL timesteps, on the VPU:
    # equals x2 @ W_ih_sparse + bias, expanded as a per-point broadcast-MAC so
    # no K=4 MXU pass / second weight push is needed.
    xw = jnp.zeros((S, Bb, G), jnp.float32) + bias_ref[...][None]
    for p in range(N):
        xw = xw + x[:, :, p:p + 1] * wih[p:p + 1, :][None]

    h = jnp.zeros((Bb, NH), jnp.float32)
    c = jnp.zeros((Bb, NH), jnp.float32)

    def cell(xw_t, h, c):
        # bf16 MXU inputs (native on v5e/v6e/v7x); accumulate + elementwise f32.
        gates = xw_t + jnp.dot(h.astype(jnp.bfloat16), whh_bf,
                               preferred_element_type=jnp.float32)
        i_g = jax.nn.sigmoid(gates[:, 0 * NH:1 * NH])
        f_g = jax.nn.sigmoid(gates[:, 1 * NH:2 * NH])
        g_g = jnp.tanh(gates[:, 2 * NH:3 * NH])
        o_g = jax.nn.sigmoid(gates[:, 3 * NH:4 * NH])
        c_new = f_g * c + i_g * g_g
        h_new = o_g * jnp.tanh(c_new)
        return h_new, c_new

    if seq_len <= 16:
        # Short sequence: full unroll (static slices, LLO scheduling visibility).
        for t in range(seq_len):
            h, c = cell(xw[t], h, c)
    else:
        # Long sequence: partially unrolled fori_loop bounds code size and vreg
        # live ranges (the chain is serial, so full unroll adds no ILP).
        def body(t, carry):
            h_c, c_c = carry
            xw_t = lax.dynamic_index_in_dim(xw, t, axis=0, keepdims=False)
            return cell(xw_t, h_c, c_c)
        h, c = lax.fori_loop(0, seq_len, body, (h, c), unroll=4)

    # Block-diagonal FC head; single unmasked lane-dense (Bb, 128) store.
    out_ref[...] = (jnp.dot(h, wfc_ref[...], preferred_element_type=jnp.float32)
                    + bfc_ref[...])


def fc_lstm_forward(x, packed, *, hidden_dim, pred_len, batch_block=256):
    """x: (batch, seq, num_points, features) f32. Returns (batch, pred_len, num_points)."""
    B, S, N, _ = x.shape
    H, P = hidden_dim, pred_len
    NH = N * H
    OUT_PAD = packed["w_fc"].shape[1]            # lane-padded (>= 128) FC width

    block_b = min(_round_up(B, 8), _round_up(batch_block, 8))
    B_pad = _round_up(B, block_b)
    num_blocks = B_pad // block_b

    # feature 0 -> time-major, batch-padded: (S, B_pad, N)
    xs = jnp.transpose(x[:, :, :, 0].astype(jnp.float32), (1, 0, 2))
    xs = jnp.pad(xs, ((0, 0), (0, B_pad - B), (0, 0)))

    kernel = functools.partial(
        _fused_lstm_fc_kernel, seq_len=S, num_points=N, fused_hidden=NH)

    flops = (2 * S * B_pad * NH * 4 * NH         # recurrent MXU matmul
             + 2 * S * B_pad * N * 4 * NH        # input projection (VPU MAC)
             + 2 * B_pad * NH * OUT_PAD)         # FC head
    transcendentals = 5 * S * B_pad * NH         # 3 sigmoid + 2 tanh per step
    bytes_accessed = (xs.size * 4 + packed["w_ih"].size * 4
                      + packed["w_hh"].size * 2 + packed["bias"].size * 4
                      + packed["w_fc"].size * 4 + packed["b_fc"].size * 4
                      + B_pad * OUT_PAD * 4)

    # TODO(synk): for very long S on v7x (64 MiB VMEM), tile S / keep the hoisted
    # xw in an explicit VMEM scratch instead of a traced intermediate.
    out = pl.pallas_call(
        kernel,
        out_shape=jax.ShapeDtypeStruct((B_pad, OUT_PAD), jnp.float32),
        grid=(num_blocks,),
        in_specs=[
            pl.BlockSpec((S, block_b, N), lambda b: (0, b, 0)),
            pl.BlockSpec((N, 4 * NH), lambda b: (0, 0)),
            pl.BlockSpec((NH, 4 * NH), lambda b: (0, 0)),
            pl.BlockSpec((1, 4 * NH), lambda b: (0, 0)),
            pl.BlockSpec((NH, OUT_PAD), lambda b: (0, 0)),
            pl.BlockSpec((1, OUT_PAD), lambda b: (0, 0)),
        ],
        out_specs=pl.BlockSpec((block_b, OUT_PAD), lambda b: (b, 0)),
        compiler_params=pltpu.CompilerParams(
            dimension_semantics=("parallel",)),
        cost_estimate=pl.CostEstimate(
            flops=flops, transcendentals=transcendentals,
            bytes_accessed=bytes_accessed),
    )(xs, packed["w_ih"], packed["w_hh"], packed["bias"],
      packed["w_fc"], packed["b_fc"])

    # (B_pad, OUT_PAD) -> valid (B, N*P) -> (B, N, P) -> (B, P, N)
    #   == torch.stack(outputs, dim=-1)
    return jnp.transpose(out[:B, :N * P].reshape(B, N, P), (0, 2, 1))


def init_raw_params(key, num_points, hidden_dim, pred_len):
    """PyTorch-style per-point params, uniform(-1/sqrt(H), 1/sqrt(H))."""
    H, P, N = hidden_dim, pred_len, num_points
    bound = 1.0 / jnp.sqrt(jnp.float32(H))
    ks = jax.random.split(key, 6)
    u = lambda k, shape: jax.random.uniform(
        k, shape, jnp.float32, minval=-bound, maxval=bound)
    return {
        "w_ih": u(ks[0], (N, 4 * H)),       # input_dim == 1, squeezed
        "w_hh": u(ks[1], (N, 4 * H, H)),    # PyTorch layout (4H, H)
        "b_ih": u(ks[2], (N, 4 * H)),
        "b_hh": u(ks[3], (N, 4 * H)),
        "w_fc": u(ks[4], (N, P, H)),        # PyTorch Linear layout (P, H)
        "b_fc": u(ks[5], (N, P)),
    }


def pack_params(raw, *, hidden_dim, pred_len):
    """Repack per-point weights into the fused gate-major / block-diagonal layout."""
    N = raw["w_ih"].shape[0]
    H, P = hidden_dim, pred_len
    NH = N * H
    OUT_PAD = max(128, _round_up(N * P, 128))   # lane-dense FC output slab
    w_ih_sp = jnp.zeros((N, 4 * NH), jnp.float32)
    w_hh_bd = jnp.zeros((NH, 4 * NH), jnp.float32)
    bias_gm = jnp.zeros((1, 4 * NH), jnp.float32)
    w_fc_bd = jnp.zeros((NH, OUT_PAD), jnp.float32)
    b_fc_pad = jnp.zeros((1, OUT_PAD), jnp.float32)
    for p in range(N):
        rows = slice(p * H, (p + 1) * H)
        for g in range(4):          # PyTorch gate order i, f, g, o
            src = slice(g * H, (g + 1) * H)
            dst = slice(g * NH + p * H, g * NH + (p + 1) * H)
            w_ih_sp = w_ih_sp.at[p, dst].set(raw["w_ih"][p, src])
            w_hh_bd = w_hh_bd.at[rows, dst].set(raw["w_hh"][p, src, :].T)
            bias_gm = bias_gm.at[0, dst].set(
                raw["b_ih"][p, src] + raw["b_hh"][p, src])
        w_fc_bd = w_fc_bd.at[rows, p * P:(p + 1) * P].set(raw["w_fc"][p].T)
    b_fc_pad = b_fc_pad.at[0, :N * P].set(raw["b_fc"].reshape(-1))
    return {"w_ih": w_ih_sp,
            # bf16 recurrent weights: native MXU dtype, half the RHS push bytes.
            "w_hh": w_hh_bd.astype(jnp.bfloat16),
            "bias": bias_gm,
            "w_fc": w_fc_bd,
            "b_fc": b_fc_pad}


def reference_forward(x, raw, *, hidden_dim):
    """Pure-JAX f32 reference (mirrors torch per-point LSTM + Linear)."""
    B, S, N, _ = x.shape
    H = hidden_dim
    xs = x[:, :, :, 0].astype(jnp.float32)
    outs = []
    for p in range(N):
        h = jnp.zeros((B, H), jnp.float32)
        c = jnp.zeros((B, H), jnp.float32)
        w_ih = raw["w_ih"][p]
        w_hh = raw["w_hh"][p]
        b = raw["b_ih"][p] + raw["b_hh"][p]
        for t in range(S):
            gates = (xs[:, t, p][:, None] * w_ih[None, :]
                     + h @ w_hh.T + b[None, :])
            i_g = jax.nn.sigmoid(gates[:, 0 * H:1 * H])
            f_g = jax.nn.sigmoid(gates[:, 1 * H:2 * H])
            g_g = jnp.tanh(gates[:, 2 * H:3 * H])
            o_g = jax.nn.sigmoid(gates[:, 3 * H:4 * H])
            c = f_g * c + i_g * g_g
            h = o_g * jnp.tanh(c)
        outs.append(h @ raw["w_fc"][p].T + raw["b_fc"][p][None, :])
    return jnp.stack(outs, axis=-1)  # (B, P, N)


if __name__ == "__main__":
    # configs: num_nodes=4, input_dim=1, hidden_dim=32, pred_len=4
    batch, seq, num_points, features = 4, 8, 4, 2
    hidden_dim, pred_len = 32, 4

    key = jax.random.PRNGKey(0)
    k_x, k_p = jax.random.split(key)
    x = jax.random.normal(k_x, (batch, seq, num_points, features),
                          dtype=jnp.float32)
    raw = init_raw_params(k_p, num_points, hidden_dim, pred_len)
    packed = pack_params(raw, hidden_dim=hidden_dim, pred_len=pred_len)

    fwd = jax.jit(functools.partial(
        fc_lstm_forward, hidden_dim=hidden_dim, pred_len=pred_len))
    out = jax.block_until_ready(fwd(x, packed))
    ref = jax.block_until_ready(
        reference_forward(x, raw, hidden_dim=hidden_dim))

    assert out.shape == (batch, pred_len, num_points), out.shape
    # Tolerance relaxed vs the pure-f32 version: the recurrent matmul now feeds
    # the MXU bf16 inputs (c / gates / elementwise math remain f32).
    assert jnp.allclose(out, ref, atol=1e-2, rtol=1e-2), (
        float(jnp.max(jnp.abs(out - ref))))
    print("KERNEL_OK")
</pallas_src>

<mosaic_0001>
module attributes {stable_mosaic.version = 11 : i64} {
  func.func @_fused_lstm_fc_kernel(%arg0: i32, %arg1: memref<8x8x4xf32, #tpu.memory_space<vmem>>, %arg2: memref<4x512xf32, #tpu.memory_space<vmem>>, %arg3: memref<128x512xbf16, #tpu.memory_space<vmem>>, %arg4: memref<1x512xf32, #tpu.memory_space<vmem>>, %arg5: memref<128x128xf32, #tpu.memory_space<vmem>>, %arg6: memref<1x128xf32, #tpu.memory_space<vmem>>, %arg7: memref<8x128xf32, #tpu.memory_space<vmem>>) attributes {dimension_semantics = [#tpu.dimension_semantics<parallel>], iteration_bounds = array<i64: 1>, scalar_prefetch = 0 : i64, scratch_operands = 0 : i64, tpu.core_type = #tpu.core_type<tc>, window_params = [{transform_indices = @transform_0, window_bounds = array<i64: 8, 8, 4>}, {pipeline_mode = #tpu.pipeline_mode<synchronous>, transform_indices = @transform_1, window_bounds = array<i64: 4, 512>}, {pipeline_mode = #tpu.pipeline_mode<synchronous>, transform_indices = @transform_2, window_bounds = array<i64: 128, 512>}, {pipeline_mode = #tpu.pipeline_mode<synchronous>, transform_indices = @transform_3, window_bounds = array<i64: 1, 512>}, {pipeline_mode = #tpu.pipeline_mode<synchronous>, transform_indices = @transform_4, window_bounds = array<i64: 128, 128>}, {pipeline_mode = #tpu.pipeline_mode<synchronous>, transform_indices = @transform_5, window_bounds = array<i64: 1, 128>}, {transform_indices = @transform_6, window_bounds = array<i64: 8, 128>}]} {
    %c0 = arith.constant 0 : index
    %c0_0 = arith.constant 0 : index
    %c0_1 = arith.constant 0 : index
    %0 = vector.load %arg1[%c0, %c0_0, %c0_1] : memref<8x8x4xf32, #tpu.memory_space<vmem>>, vector<8x8x4xf32>
    %c0_2 = arith.constant 0 : index
    %c0_3 = arith.constant 0 : index
    %1 = vector.load %arg2[%c0_2, %c0_3] : memref<4x512xf32, #tpu.memory_space<vmem>>, vector<4x512xf32>
    %c0_4 = arith.constant 0 : index
    %c0_5 = arith.constant 0 : index
    %2 = vector.load %arg3[%c0_4, %c0_5] : memref<128x512xbf16, #tpu.memory_space<vmem>>, vector<128x512xbf16>
    %cst = arith.constant 0.000000e+00 : f32
    %3 = vector.broadcast %cst : f32 to vector<8x8x512xf32>
    %c0_6 = arith.constant 0 : index
    %c0_7 = arith.constant 0 : index
    %4 = vector.load %arg4[%c0_6, %c0_7] : memref<1x512xf32, #tpu.memory_space<vmem>>, vector<1x512xf32>
    %5 = vector.shape_cast %4 : vector<1x512xf32> to vector<1x1x512xf32>
    %6 = vector.broadcast %5 : vector<1x1x512xf32> to vector<8x8x512xf32>
    %7 = arith.addf %3, %6 : vector<8x8x512xf32>
    %8 = vector.extract_strided_slice %0 {offsets = [0, 0, 0], sizes = [8, 8, 1], strides = [1, 1, 1]} : vector<8x8x4xf32> to vector<8x8x1xf32>
    %9 = vector.extract_strided_slice %1 {offsets = [0, 0], sizes = [1, 512], strides = [1, 1]} : vector<4x512xf32> to vector<1x512xf32>
    %10 = vector.shape_cast %9 : vector<1x512xf32> to vector<1x1x512xf32>
    %11 = vector.broadcast %8 : vector<8x8x1xf32> to vector<8x8x512xf32>
    %12 = vector.broadcast %10 : vector<1x1x512xf32> to vector<8x8x512xf32>
    %13 = arith.mulf %11, %12 : vector<8x8x512xf32>
    %14 = arith.addf %7, %13 : vector<8x8x512xf32>
    %15 = vector.extract_strided_slice %0 {offsets = [0, 0, 1], sizes = [8, 8, 1], strides = [1, 1, 1]} : vector<8x8x4xf32> to vector<8x8x1xf32>
    %16 = vector.extract_strided_slice %1 {offsets = [1, 0], sizes = [1, 512], strides = [1, 1]} : vector<4x512xf32> to vector<1x512xf32>
    %17 = vector.shape_cast %16 : vector<1x512xf32> to vector<1x1x512xf32>
    %18 = vector.broadcast %15 : vector<8x8x1xf32> to vector<8x8x512xf32>
    %19 = vector.broadcast %17 : vector<1x1x512xf32> to vector<8x8x512xf32>
    %20 = arith.mulf %18, %19 : vector<8x8x512xf32>
    %21 = arith.addf %14, %20 : vector<8x8x512xf32>
    %22 = vector.extract_strided_slice %0 {offsets = [0, 0, 2], sizes = [8, 8, 1], strides = [1, 1, 1]} : vector<8x8x4xf32> to vector<8x8x1xf32>
    %23 = vector.extract_strided_slice %1 {offsets = [2, 0], sizes = [1, 512], strides = [1, 1]} : vector<4x512xf32> to vector<1x512xf32>
    %24 = vector.shape_cast %23 : vector<1x512xf32> to vector<1x1x512xf32>
    %25 = vector.broadcast %22 : vector<8x8x1xf32> to vector<8x8x512xf32>
    %26 = vector.broadcast %24 : vector<1x1x512xf32> to vector<8x8x512xf32>
    %27 = arith.mulf %25, %26 : vector<8x8x512xf32>
    %28 = arith.addf %21, %27 : vector<8x8x512xf32>
    %29 = vector.extract_strided_slice %0 {offsets = [0, 0, 3], sizes = [8, 8, 1], strides = [1, 1, 1]} : vector<8x8x4xf32> to vector<8x8x1xf32>
    %30 = vector.extract_strided_slice %1 {offsets = [3, 0], sizes = [1, 512], strides = [1, 1]} : vector<4x512xf32> to vector<1x512xf32>
    %31 = vector.shape_cast %30 : vector<1x512xf32> to vector<1x1x512xf32>
    %32 = vector.broadcast %29 : vector<8x8x1xf32> to vector<8x8x512xf32>
    %33 = vector.broadcast %31 : vector<1x1x512xf32> to vector<8x8x512xf32>
    %34 = arith.mulf %32, %33 : vector<8x8x512xf32>
    %35 = arith.addf %28, %34 : vector<8x8x512xf32>
    %cst_8 = arith.constant 0.000000e+00 : f32
    %36 = vector.broadcast %cst_8 : f32 to vector<8x128xf32>
    %cst_9 = arith.constant 0.000000e+00 : f32
    %37 = vector.broadcast %cst_9 : f32 to vector<8x128xf32>
    %38 = vector.extract_strided_slice %35 {offsets = [0, 0, 0], sizes = [1, 8, 512], strides = [1, 1, 1]} : vector<8x8x512xf32> to vector<1x8x512xf32>
    %39 = vector.shape_cast %38 : vector<1x8x512xf32> to vector<8x512xf32>
    %40 = arith.truncf %36 : vector<8x128xf32> to vector<8x128xbf16>
    %cst_10 = arith.constant dense<0.000000e+00> : vector<8x512xf32>
    %41 = tpu.matmul %40, %2, %cst_10 {dimension_numbers = #tpu.dot_dimension_numbers<[1], [0], [0], [1], [0, 0, 1, 1], [], []>} : vector<8x128xbf16>, vector<128x512xbf16>, vector<8x512xf32> -> vector<8x512xf32>
    %42 = arith.addf %39, %41 : vector<8x512xf32>
    %43 = vector.extract_strided_slice %42 {offsets = [0, 0], sizes = [8, 128], strides = [1, 1]} : vector<8x512xf32> to vector<8x128xf32>
    %44 = arith.negf %43 : vector<8x128xf32>
    %45 = math.exp %44 : vector<8x128xf32>
    %cst_11 = arith.constant 1.000000e+00 : f32
    %46 = vector.broadcast %cst_11 : f32 to vector<8x128xf32>
    %47 = arith.addf %46, %45 : vector<8x128xf32>
    %48 = arith.divf %46, %47 : vector<8x128xf32>
    %49 = vector.extract_strided_slice %42 {offsets = [0, 128], sizes = [8, 128], strides = [1, 1]} : vector<8x512xf32> to vector<8x128xf32>
    %50 = arith.negf %49 : vector<8x128xf32>
    %51 = math.exp %50 : vector<8x128xf32>
    %cst_12 = arith.constant 1.000000e+00 : f32
    %52 = vector.broadcast %cst_12 : f32 to vector<8x128xf32>
    %53 = arith.addf %52, %51 : vector<8x128xf32>
    %54 = arith.divf %52, %53 : vector<8x128xf32>
    %55 = vector.extract_strided_slice %42 {offsets = [0, 256], sizes = [8, 128], strides = [1, 1]} : vector<8x512xf32> to vector<8x128xf32>
    %56 = math.tanh %55 : vector<8x128xf32>
    %57 = vector.extract_strided_slice %42 {offsets = [0, 384], sizes = [8, 128], strides = [1, 1]} : vector<8x512xf32> to vector<8x128xf32>
    %58 = arith.negf %57 : vector<8x128xf32>
    %59 = math.exp %58 : vector<8x128xf32>
    %cst_13 = arith.constant 1.000000e+00 : f32
    %60 = vector.broadcast %cst_13 : f32 to vector<8x128xf32>
    %61 = arith.addf %60, %59 : vector<8x128xf32>
    %62 = arith.divf %60, %61 : vector<8x128xf32>
    %63 = arith.mulf %54, %37 : vector<8x128xf32>
    %64 = arith.mulf %48, %56 : vector<8x128xf32>
    %65 = arith.addf %63, %64 : vector<8x128xf32>
    %66 = math.tanh %65 : vector<8x128xf32>
    %67 = arith.mulf %62, %66 : vector<8x128xf32>
    %68 = vector.extract_strided_slice %35 {offsets = [1, 0, 0], sizes = [1, 8, 512], strides = [1, 1, 1]} : vector<8x8x512xf32> to vector<1x8x512xf32>
    %69 = vector.shape_cast %68 : vector<1x8x512xf32> to vector<8x512xf32>
    %70 = arith.truncf %67 : vector<8x128xf32> to vector<8x128xbf16>
    %cst_14 = arith.constant dense<0.000000e+00> : vector<8x512xf32>
    %71 = tpu.matmul %70, %2, %cst_14 {dimension_numbers = #tpu.dot_dimension_numbers<[1], [0], [0], [1], [0, 0, 1, 1], [], []>} : vector<8x128xbf16>, vector<128x512xbf16>, vector<8x512xf32> -> vector<8x512xf32>
    %72 = arith.addf %69, %71 : vector<8x512xf32>
    %73 = vector.extract_strided_slice %72 {offsets = [0, 0], sizes = [8, 128], strides = [1, 1]} : vector<8x512xf32> to vector<8x128xf32>
    %74 = arith.negf %73 : vector<8x128xf32>
    %75 = math.exp %74 : vector<8x128xf32>
    %cst_15 = arith.constant 1.000000e+00 : f32
    %76 = vector.broadcast %cst_15 : f32 to vector<8x128xf32>
    %77 = arith.addf %76, %75 : vector<8x128xf32>
    %78 = arith.divf %76, %77 : vector<8x128xf32>
    %79 = vector.extract_strided_slice %72 {offsets = [0, 128], sizes = [8, 128], strides = [1, 1]} : vector<8x512xf32> to vector<8x128xf32>
    %80 = arith.negf %79 : vector<8x128xf32>
    %81 = math.exp %80 : vector<8x128xf32>
    %cst_16 = arith.constant 1.000000e+00 : f32
    %82 = vector.broadcast %cst_16 : f32 to vector<8x128xf32>
    %83 = arith.addf %82, %81 : vector<8x128xf32>
    %84 = arith.divf %82, %83 : vector<8x128xf32>
    %85 = vector.extract_strided_slice %72 {offsets = [0, 256], sizes = [8, 128], strides = [1, 1]} : vector<8x512xf32> to vector<8x128xf32>
    %86 = math.tanh %85 : vector<8x128xf32>
    %87 = vector.extract_strided_slice %72 {offsets = [0, 384], sizes = [8, 128], strides = [1, 1]} : vector<8x512xf32> to vector<8x128xf32>
    %88 = arith.negf %87 : vector<8x128xf32>
    %89 = math.exp %88 : vector<8x128xf32>
    %cst_17 = arith.constant 1.000000e+00 : f32
    %90 = vector.broadcast %cst_17 : f32 to vector<8x128xf32>
    %91 = arith.addf %90, %89 : vector<8x128xf32>
    %92 = arith.divf %90, %91 : vector<8x128xf32>
    %93 = arith.mulf %84, %65 : vector<8x128xf32>
    %94 = arith.mulf %78, %86 : vector<8x128xf32>
    %95 = arith.addf %93, %94 : vector<8x128xf32>
    %96 = math.tanh %95 : vector<8x128xf32>
    %97 = arith.mulf %92, %96 : vector<8x128xf32>
    %98 = vector.extract_strided_slice %35 {offsets = [2, 0, 0], sizes = [1, 8, 512], strides = [1, 1, 1]} : vector<8x8x512xf32> to vector<1x8x512xf32>
    %99 = vector.shape_cast %98 : vector<1x8x512xf32> to vector<8x512xf32>
    %100 = arith.truncf %97 : vector<8x128xf32> to vector<8x128xbf16>
    %cst_18 = arith.constant dense<0.000000e+00> : vector<8x512xf32>
    %101 = tpu.matmul %100, %2, %cst_18 {dimension_numbers = #tpu.dot_dimension_numbers<[1], [0], [0], [1], [0, 0, 1, 1], [], []>} : vector<8x128xbf16>, vector<128x512xbf16>, vector<8x512xf32> -> vector<8x512xf32>
    %102 = arith.addf %99, %101 : vector<8x512xf32>
    %103 = vector.extract_strided_slice %102 {offsets = [0, 0], sizes = [8, 128], strides = [1, 1]} : vector<8x512xf32> to vector<8x128xf32>
    %104 = arith.negf %103 : vector<8x128xf32>
    %105 = math.exp %104 : vector<8x128xf32>
    %cst_19 = arith.constant 1.000000e+00 : f32
    %106 = vector.broadcast %cst_19 : f32 to vector<8x128xf32>
    %107 = arith.addf %106, %105 : vector<8x128xf32>
    %108 = arith.divf %106, %107 : vector<8x128xf32>
    %109 = vector.extract_strided_slice %102 {offsets = [0, 128], sizes = [8, 128], strides = [1, 1]} : vector<8x512xf32> to vector<8x128xf32>
    %110 = arith.negf %109 : vector<8x128xf32>
    %111 = math.exp %110 : vector<8x128xf32>
    %cst_20 = arith.constant 1.000000e+00 : f32
    %112 = vector.broadcast %cst_20 : f32 to vector<8x128xf32>
    %113 = arith.addf %112, %111 : vector<8x128xf32>
    %114 = arith.divf %112, %113 : vector<8x128xf32>
    %115 = vector.extract_strided_slice %102 {offsets = [0, 256], sizes = [8, 128], strides = [1, 1]} : vector<8x512xf32> to vector<8x128xf32>
    %116 = math.tanh %115 : vector<8x128xf32>
    %117 = vector.extract_strided_slice %102 {offsets = [0, 384], sizes = [8, 128], strides = [1, 1]} : vector<8x512xf32> to vector<8x128xf32>
    %118 = arith.negf %117 : vector<8x128xf32>
    %119 = math.exp %118 : vector<8x128xf32>
    %cst_21 = arith.constant 1.000000e+00 : f32
    %120 = vector.broadcast %cst_21 : f32 to vector<8x128xf32>
    %121 = arith.addf %120, %119 : vector<8x128xf32>
    %122 = arith.divf %120, %121 : vector<8x128xf32>
    %123 = arith.mulf %114, %95 : vector<8x128xf32>
    %124 = arith.mulf %108, %116 : vector<8x128xf32>
    %125 = arith.addf %123, %124 : vector<8x128xf32>
    %126 = math.tanh %125 : vector<8x128xf32>
    %127 = arith.mulf %122, %126 : vector<8x128xf32>
    %128 = vector.extract_strided_slice %35 {offsets = [3, 0, 0], sizes = [1, 8, 512], strides = [1, 1, 1]} : vector<8x8x512xf32> to vector<1x8x512xf32>
    %129 = vector.shape_cast %128 : vector<1x8x512xf32> to vector<8x512xf32>
    %130 = arith.truncf %127 : vector<8x128xf32> to vector<8x128xbf16>
    %cst_22 = arith.constant dense<0.000000e+00> : vector<8x512xf32>
    %131 = tpu.matmul %130, %2, %cst_22 {dimension_numbers = #tpu.dot_dimension_numbers<[1], [0], [0], [1], [0, 0, 1, 1], [], []>} : vector<8x128xbf16>, vector<128x512xbf16>, vector<8x512xf32> -> vector<8x512xf32>
    %132 = arith.addf %129, %131 : vector<8x512xf32>
    %133 = vector.extract_strided_slice %132 {offsets = [0, 0], sizes = [8, 128], strides = [1, 1]} : vector<8x512xf32> to vector<8x128xf32>
    %134 = arith.negf %133 : vector<8x128xf32>
    %135 = math.exp %134 : vector<8x128xf32>
    %cst_23 = arith.constant 1.000000e+00 : f32
    %136 = vector.broadcast %cst_23 : f32 to vector<8x128xf32>
    %137 = arith.addf %136, %135 : vector<8x128xf32>
    %138 = arith.divf %136, %137 : vector<8x128xf32>
    %139 = vector.extract_strided_slice %132 {offsets = [0, 128], sizes = [8, 128], strides = [1, 1]} : vector<8x512xf32> to vector<8x128xf32>
    %140 = arith.negf %139 : vector<8x128xf32>
    %141 = math.exp %140 : vector<8x128xf32>
    %cst_24 = arith.constant 1.000000e+00 : f32
    %142 = vector.broadcast %cst_24 : f32 to vector<8x128xf32>
    %143 = arith.addf %142, %141 : vector<8x128xf32>
    %144 = arith.divf %142, %143 : vector<8x128xf32>
    %145 = vector.extract_strided_slice %132 {offsets = [0, 256], sizes = [8, 128], strides = [1, 1]} : vector<8x512xf32> to vector<8x128xf32>
    %146 = math.tanh %145 : vector<8x128xf32>
    %147 = vector.extract_strided_slice %132 {offsets = [0, 384], sizes = [8, 128], strides = [1, 1]} : vector<8x512xf32> to vector<8x128xf32>
    %148 = arith.negf %147 : vector<8x128xf32>
    %149 = math.exp %148 : vector<8x128xf32>
    %cst_25 = arith.constant 1.000000e+00 : f32
    %150 = vector.broadcast %cst_25 : f32 to vector<8x128xf32>
    %151 = arith.addf %150, %149 : vector<8x128xf32>
    %152 = arith.divf %150, %151 : vector<8x128xf32>
    %153 = arith.mulf %144, %125 : vector<8x128xf32>
    %154 = arith.mulf %138, %146 : vector<8x128xf32>
    %155 = arith.addf %153, %154 : vector<8x128xf32>
    %156 = math.tanh %155 : vector<8x128xf32>
    %157 = arith.mulf %152, %156 : vector<8x128xf32>
    %158 = vector.extract_strided_slice %35 {offsets = [4, 0, 0], sizes = [1, 8, 512], strides = [1, 1, 1]} : vector<8x8x512xf32> to vector<1x8x512xf32>
    %159 = vector.shape_cast %158 : vector<1x8x512xf32> to vector<8x512xf32>
    %160 = arith.truncf %157 : vector<8x128xf32> to vector<8x128xbf16>
    %cst_26 = arith.constant dense<0.000000e+00> : vector<8x512xf32>
    %161 = tpu.matmul %160, %2, %cst_26 {dimension_numbers = #tpu.dot_dimension_numbers<[1], [0], [0], [1], [0, 0, 1, 1], [], []>} : vector<8x128xbf16>, vector<128x512xbf16>, vector<8x512xf32> -> vector<8x512xf32>
    %162 = arith.addf %159, %161 : vector<8x512xf32>
    %163 = vector.extract_strided_slice %162 {offsets = [0, 0], sizes = [8, 128], strides = [1, 1]} : vector<8x512xf32> to vector<8x128xf32>
    %164 = arith.negf %163 : vector<8x128xf32>
    %165 = math.exp %164 : vector<8x128xf32>
    %cst_27 = arith.constant 1.000000e+00 : f32
    %166 = vector.broadcast %cst_27 : f32 to vector<8x128xf32>
    %167 = arith.addf %166, %165 : vector<8x128xf32>
    %168 = arith.divf %166, %167 : vector<8x128xf32>
    %169 = vector.extract_strided_slice %162 {offsets = [0, 128], sizes = [8, 128], strides = [1, 1]} : vector<8x512xf32> to vector<8x128xf32>
    %170 = arith.negf %169 : vector<8x128xf32>
    %171 = math.exp %170 : vector<8x128xf32>
    %cst_28 = arith.constant 1.000000e+00 : f32
    %172 = vector.broadcast %cst_28 : f32 to vector<8x128xf32>
    %173 = arith.addf %172, %171 : vector<8x128xf32>
    %174 = arith.divf %172, %173 : vector<8x128xf32>
    %175 = vector.extract_strided_slice %162 {offsets = [0, 256], sizes = [8, 128], strides = [1, 1]} : vector<8x512xf32> to vector<8x128xf32>
    %176 = math.tanh %175 : vector<8x128xf32>
    %177 = vector.extract_strided_slice %162 {offsets = [0, 384], sizes = [8, 128], strides = [1, 1]} : vector<8x512xf32> to vector<8x128xf32>
    %178 = arith.negf %177 : vector<8x128xf32>
    %179 = math.exp %178 : vector<8x128xf32>
    %cst_29 = arith.constant 1.000000e+00 : f32
    %180 = vector.broadcast %cst_29 : f32 to vector<8x128xf32>
    %181 = arith.addf %180, %179 : vector<8x128xf32>
    %182 = arith.divf %180, %181 : vector<8x128xf32>
    %183 = arith.mulf %174, %155 : vector<8x128xf32>
    %184 = arith.mulf %168, %176 : vector<8x128xf32>
    %185 = arith.addf %183, %184 : vector<8x128xf32>
    %186 = math.tanh %185 : vector<8x128xf32>
    %187 = arith.mulf %182, %186 : vector<8x128xf32>
    %188 = vector.extract_strided_slice %35 {offsets = [5, 0, 0], sizes = [1, 8, 512], strides = [1, 1, 1]} : vector<8x8x512xf32> to vector<1x8x512xf32>
    %189 = vector.shape_cast %188 : vector<1x8x512xf32> to vector<8x512xf32>
    %190 = arith.truncf %187 : vector<8x128xf32> to vector<8x128xbf16>
    %cst_30 = arith.constant dense<0.000000e+00> : vector<8x512xf32>
    %191 = tpu.matmul %190, %2, %cst_30 {dimension_numbers = #tpu.dot_dimension_numbers<[1], [0], [0], [1], [0, 0, 1, 1], [], []>} : vector<8x128xbf16>, vector<128x512xbf16>, vector<8x512xf32> -> vector<8x512xf32>
    %192 = arith.addf %189, %191 : vector<8x512xf32>
    %193 = vector.extract_strided_slice %192 {offsets = [0, 0], sizes = [8, 128], strides = [1, 1]} : vector<8x512xf32> to vector<8x128xf32>
    %194 = arith.negf %193 : vector<8x128xf32>
    %195 = math.exp %194 : vector<8x128xf32>
    %cst_31 = arith.constant 1.000000e+00 : f32
    %196 = vector.broadcast %cst_31 : f32 to vector<8x128xf32>
    %197 = arith.addf %196, %195 : vector<8x128xf32>
    %198 = arith.divf %196, %197 : vector<8x128xf32>
    %199 = vector.extract_strided_slice %192 {offsets = [0, 128], sizes = [8, 128], strides = [1, 1]} : vector<8x512xf32> to vector<8x128xf32>
    %200 = arith.negf %199 : vector<8x128xf32>
    %201 = math.exp %200 : vector<8x128xf32>
    %cst_32 = arith.constant 1.000000e+00 : f32
    %202 = vector.broadcast %cst_32 : f32 to vector<8x128xf32>
    %203 = arith.addf %202, %201 : vector<8x128xf32>
    %204 = arith.divf %202, %203 : vector<8x128xf32>
    %205 = vector.extract_strided_slice %192 {offsets = [0, 256], sizes = [8, 128], strides = [1, 1]} : vector<8x512xf32> to vector<8x128xf32>
    %206 = math.tanh %205 : vector<8x128xf32>
    %207 = vector.extract_strided_slice %192 {offsets = [0, 384], sizes = [8, 128], strides = [1, 1]} : vector<8x512xf32> to vector<8x128xf32>
    %208 = arith.negf %207 : vector<8x128xf32>
    %209 = math.exp %208 : vector<8x128xf32>
    %cst_33 = arith.constant 1.000000e+00 : f32
    %210 = vector.broadcast %cst_33 : f32 to vector<8x128xf32>
    %211 = arith.addf %210, %209 : vector<8x128xf32>
    %212 = arith.divf %210, %211 : vector<8x128xf32>
    %213 = arith.mulf %204, %185 : vector<8x128xf32>
    %214 = arith.mulf %198, %206 : vector<8x128xf32>
    %215 = arith.addf %213, %214 : vector<8x128xf32>
    %216 = math.tanh %215 : vector<8x128xf32>
    %217 = arith.mulf %212, %216 : vector<8x128xf32>
    %218 = vector.extract_strided_slice %35 {offsets = [6, 0, 0], sizes = [1, 8, 512], strides = [1, 1, 1]} : vector<8x8x512xf32> to vector<1x8x512xf32>
    %219 = vector.shape_cast %218 : vector<1x8x512xf32> to vector<8x512xf32>
    %220 = arith.truncf %217 : vector<8x128xf32> to vector<8x128xbf16>
    %cst_34 = arith.constant dense<0.000000e+00> : vector<8x512xf32>
    %221 = tpu.matmul %220, %2, %cst_34 {dimension_numbers = #tpu.dot_dimension_numbers<[1], [0], [0], [1], [0, 0, 1, 1], [], []>} : vector<8x128xbf16>, vector<128x512xbf16>, vector<8x512xf32> -> vector<8x512xf32>
    %222 = arith.addf %219, %221 : vector<8x512xf32>
    %223 = vector.extract_strided_slice %222 {offsets = [0, 0], sizes = [8, 128], strides = [1, 1]} : vector<8x512xf32> to vector<8x128xf32>
    %224 = arith.negf %223 : vector<8x128xf32>
    %225 = math.exp %224 : vector<8x128xf32>
    %cst_35 = arith.constant 1.000000e+00 : f32
    %226 = vector.broadcast %cst_35 : f32 to vector<8x128xf32>
    %227 = arith.addf %226, %225 : vector<8x128xf32>
    %228 = arith.divf %226, %227 : vector<8x128xf32>
    %229 = vector.extract_strided_slice %222 {offsets = [0, 128], sizes = [8, 128], strides = [1, 1]} : vector<8x512xf32> to vector<8x128xf32>
    %230 = arith.negf %229 : vector<8x128xf32>
    %231 = math.exp %230 : vector<8x128xf32>
    %cst_36 = arith.constant 1.000000e+00 : f32
    %232 = vector.broadcast %cst_36 : f32 to vector<8x128xf32>
    %233 = arith.addf %232, %231 : vector<8x128xf32>
    %234 = arith.divf %232, %233 : vector<8x128xf32>
    %235 = vector.extract_strided_slice %222 {offsets = [0, 256], sizes = [8, 128], strides = [1, 1]} : vector<8x512xf32> to vector<8x128xf32>
    %236 = math.tanh %235 : vector<8x128xf32>
    %237 = vector.extract_strided_slice %222 {offsets = [0, 384], sizes = [8, 128], strides = [1, 1]} : vector<8x512xf32> to vector<8x128xf32>
    %238 = arith.negf %237 : vector<8x128xf32>
    %239 = math.exp %238 : vector<8x128xf32>
    %cst_37 = arith.constant 1.000000e+00 : f32
    %240 = vector.broadcast %cst_37 : f32 to vector<8x128xf32>
    %241 = arith.addf %240, %239 : vector<8x128xf32>
    %242 = arith.divf %240, %241 : vector<8x128xf32>
    %243 = arith.mulf %234, %215 : vector<8x128xf32>
    %244 = arith.mulf %228, %236 : vector<8x128xf32>
    %245 = arith.addf %243, %244 : vector<8x128xf32>
    %246 = math.tanh %245 : vector<8x128xf32>
    %247 = arith.mulf %242, %246 : vector<8x128xf32>
    %248 = vector.extract_strided_slice %35 {offsets = [7, 0, 0], sizes = [1, 8, 512], strides = [1, 1, 1]} : vector<8x8x512xf32> to vector<1x8x512xf32>
    %249 = vector.shape_cast %248 : vector<1x8x512xf32> to vector<8x512xf32>
    %250 = arith.truncf %247 : vector<8x128xf32> to vector<8x128xbf16>
    %cst_38 = arith.constant dense<0.000000e+00> : vector<8x512xf32>
    %251 = tpu.matmul %250, %2, %cst_38 {dimension_numbers = #tpu.dot_dimension_numbers<[1], [0], [0], [1], [0, 0, 1, 1], [], []>} : vector<8x128xbf16>, vector<128x512xbf16>, vector<8x512xf32> -> vector<8x512xf32>
    %252 = arith.addf %249, %251 : vector<8x512xf32>
    %253 = vector.extract_strided_slice %252 {offsets = [0, 0], sizes = [8, 128], strides = [1, 1]} : vector<8x512xf32> to vector<8x128xf32>
    %254 = arith.negf %253 : vector<8x128xf32>
    %255 = math.exp %254 : vector<8x128xf32>
    %cst_39 = arith.constant 1.000000e+00 : f32
    %256 = vector.broadcast %cst_39 : f32 to vector<8x128xf32>
    %257 = arith.addf %256, %255 : vector<8x128xf32>
    %258 = arith.divf %256, %257 : vector<8x128xf32>
    %259 = vector.extract_strided_slice %252 {offsets = [0, 128], sizes = [8, 128], strides = [1, 1]} : vector<8x512xf32> to vector<8x128xf32>
    %260 = arith.negf %259 : vector<8x128xf32>
    %261 = math.exp %260 : vector<8x128xf32>
    %cst_40 = arith.constant 1.000000e+00 : f32
    %262 = vector.broadcast %cst_40 : f32 to vector<8x128xf32>
    %263 = arith.addf %262, %261 : vector<8x128xf32>
    %264 = arith.divf %262, %263 : vector<8x128xf32>
    %265 = vector.extract_strided_slice %252 {offsets = [0, 256], sizes = [8, 128], strides = [1, 1]} : vector<8x512xf32> to vector<8x128xf32>
    %266 = math.tanh %265 : vector<8x128xf32>
    %267 = vector.extract_strided_slice %252 {offsets = [0, 384], sizes = [8, 128], strides = [1, 1]} : vector<8x512xf32> to vector<8x128xf32>
    %268 = arith.negf %267 : vector<8x128xf32>
    %269 = math.exp %268 : vector<8x128xf32>
    %cst_41 = arith.constant 1.000000e+00 : f32
    %270 = vector.broadcast %cst_41 : f32 to vector<8x128xf32>
    %271 = arith.addf %270, %269 : vector<8x128xf32>
    %272 = arith.divf %270, %271 : vector<8x128xf32>
    %273 = arith.mulf %264, %245 : vector<8x128xf32>
    %274 = arith.mulf %258, %266 : vector<8x128xf32>
    %275 = arith.addf %273, %274 : vector<8x128xf32>
    %276 = math.tanh %275 : vector<8x128xf32>
    %277 = arith.mulf %272, %276 : vector<8x128xf32>
    %c0_42 = arith.constant 0 : index
    %c0_43 = arith.constant 0 : index
    %278 = vector.load %arg5[%c0_42, %c0_43] : memref<128x128xf32, #tpu.memory_space<vmem>>, vector<128x128xf32>
    %cst_44 = arith.constant dense<0.000000e+00> : vector<8x128xf32>
    %279 = tpu.matmul %277, %278, %cst_44 {dimension_numbers = #tpu.dot_dimension_numbers<[1], [0], [0], [1], [0, 0, 1, 1], [], []>} : vector<8x128xf32>, vector<128x128xf32>, vector<8x128xf32> -> vector<8x128xf32>
    %c0_45 = arith.constant 0 : index
    %c0_46 = arith.constant 0 : index
    %280 = vector.load %arg6[%c0_45, %c0_46] : memref<1x128xf32, #tpu.memory_space<vmem>>, vector<1x128xf32>
    %281 = vector.broadcast %280 : vector<1x128xf32> to vector<8x128xf32>
    %282 = arith.addf %279, %281 : vector<8x128xf32>
    %c0_47 = arith.constant 0 : index
    %c0_48 = arith.constant 0 : index
    %283 = vector.load %arg7[%c0_47, %c0_48] : memref<8x128xf32, #tpu.memory_space<vmem>>, vector<8x128xf32>
    tpu.vector_store %arg7[%c0_47, %c0_48], %282 {strides = array<i32>} : memref<8x128xf32, #tpu.memory_space<vmem>>, vector<8x128xf32>,
    return
  }
  func.func @transform_0(%arg0: i32) -> (i32, i32, i32) {
    %c0_i32 = arith.constant 0 : i32
    %c0_i32_0 = arith.constant 0 : i32
    %c0_i32_1 = arith.constant 0 : i32
    return %c0_i32, %arg0, %c0_i32_0 : i32, i32, i32
  }
  func.func @transform_1(%arg0: i32) -> (i32, i32) {
    %c0_i32 = arith.constant 0 : i32
    %c0_i32_0 = arith.constant 0 : i32
    %c0_i32_1 = arith.constant 0 : i32
    return %c0_i32, %c0_i32_0 : i32, i32
  }
  func.func @transform_2(%arg0: i32) -> (i32, i32) {
    %c0_i32 = arith.constant 0 : i32
    %c0_i32_0 = arith.constant 0 : i32
    %c0_i32_1 = arith.constant 0 : i32
    return %c0_i32, %c0_i32_0 : i32, i32
  }
  func.func @transform_3(%arg0: i32) -> (i32, i32) {
    %c0_i32 = arith.constant 0 : i32
    %c0_i32_0 = arith.constant 0 : i32
    %c0_i32_1 = arith.constant 0 : i32
    return %c0_i32, %c0_i32_0 : i32, i32
  }
  func.func @transform_4(%arg0: i32) -> (i32, i32) {
    %c0_i32 = arith.constant 0 : i32
    %c0_i32_0 = arith.constant 0 : i32
    %c0_i32_1 = arith.constant 0 : i32
    return %c0_i32, %c0_i32_0 : i32, i32
  }
  func.func @transform_5(%arg0: i32) -> (i32, i32) {
    %c0_i32 = arith.constant 0 : i32
    %c0_i32_0 = arith.constant 0 : i32
    %c0_i32_1 = arith.constant 0 : i32
    return %c0_i32, %c0_i32_0 : i32, i32
  }
  func.func @transform_6(%arg0: i32) -> (i32, i32) {
    %c0_i32 = arith.constant 0 : i32
    %c0_i32_0 = arith.constant 0 : i32
    return %arg0, %c0_i32 : i32, i32
  }
}

</mosaic_0001>

<bundles_post_ra>
// kernel: fc_lstm_forward.1
= control target key start
LH: loop header
LB: loop body
LE: loop exit
PB: predicated region body
PF: predicated region fallthrough
CT: control target
= control target key end

     0   :  { %11 = vsyncpa [#allocation3], 0  ;;  %s2196_s21 = smov [#allocation2]   ;;  %s3011_s0 = inlined_call_operand.vmem [shape: f32[8,8,4], index: 0, kind: input, shape index: {}]   ;;  %s3012_s1 = inlined_call_operand.vmem [shape: f32[4,512], index: 1, kind: input, shape index: {}]   ;;  %s3013_s2 = inlined_call_operand.hbm [shape: bf16[128,512], index: 2, kind: input, shape index: {}]   ;;  %s3014_s3 = inlined_call_operand.vmem [shape: f32[1,512], index: 3, kind: input, shape index: {}]   ;;  %s3015_s4 = inlined_call_operand.vmem [shape: f32[128,128], index: 4, kind: input, shape index: {}]   ;;  %s3016_s5 = inlined_call_operand.vmem [shape: f32[1,128], index: 5, kind: input, shape index: {}]   ;;  %s3017_s6 = inlined_call_operand.vmem [shape: f32[8,128], index: 6, kind: output, shape index: {}]  }
   0x1   :  { %s21_s22 = sshll.u32 %s2196_s21, 4  ;;  %s2172_s25 = scalar_lea.hbm %s3013_s2, 4096  ;;  %s22_s22 = int_to_ptr.vmem [resolvable:$true] %s21_s22 }
   0x2   :  { %p2173_p0 = scmp.ne.s32.totalorder %s3013_s2, %s2172_s25  ;;  %p2176_p1 = scmp.lt.u32.totalorder %s2172_s25, %s3013_s2 }
   0x4   :  { %p2178_p2 = pnand %p2176_p1, %p2173_p0 }
   0x6   :  { %2181 = shalt.err (!%p2178_p2)
}
   0x7   :  { %s2182_s30 = scalar_lea.vmem %s22_s22, 4096  ;;  %p2187_p4 = scmp.lt.s32.totalorder %s22_s22, %s22_s22 }
   0x8   :  { %p2183_p3 = scmp.ne.s32.totalorder %s22_s22, %s2182_s30  ;;  %p2188_p5 = scmp.lt.s32.totalorder %s2182_s30, %s2182_s30 }
   0xa   :  { %p2189_p6 = por %p2188_p5, %p2187_p4 }
   0xc   :  { %p2190_p7 = pnand %p2189_p6, %p2183_p3 }
   0xe   :  { %2193 = shalt.err (!%p2190_p7)
}
   0xf   :  { %s2197_s7 = smov 256   ;;  %s2198_s8 = smov 16  }
  0x10   :  { %27 = dma.hbm_to_vmem [thread:$0]  %s3013_s2, 4096, %s22_s22, [#allocation3], %s2197_s7, %s2197_s7, %s2198_s8  }
  0x11   :  { %2194 = dma.done.wait [#allocation3], 4096  }
  0x12   :  { %2195 = vsyncadd [#allocation3], 4294963200  ;;  %v3024_v0 = vmov 0   ;;  %v3018_v1 = vmov 2   ;;  %v2257_v2 = vld [vmem:[#allocation2 + $0x4] ss:$16 sps:$4 sm:$0xff]   ;;  %v82_v38 = vlaneseq }
  0x13   :  { %836 = vmatprep.mubr.bf16.mxu0 %v3024_v0  ;;  %877 = vmatprep.mubr.bf16.mxu1 %v3024_v0  ;;  %3088 = vst [vmem:[#allocation5_spill] sm:$0xff] %v2257_v2  ;;  %v2259_v3 = vld [vmem:[#allocation2 + $0xc] ss:$16 sps:$4 sm:$0xff]   ;;  %v2262_v4 = vld [vmem:[#allocation2] ss:$16 sps:$4 sm:$0xff]   ;;  %v3020_v33 = vmov 3  }
  0x14   :  { %1935 = vset.pattern.permute.xlu1 %v3018_v1  ;;  %1933 = vset.pattern.permute.xlu0 %v3024_v0  ;;  %3089 = vst [vmem:[#allocation6_spill] sm:$0xff] %v2259_v3  ;;  %v2264_v5 = vld [vmem:[#allocation2 + $0x8] ss:$16 sps:$4 sm:$0xff]   ;;  %v2267_v6 = vld [vmem:[#allocation2 + $0x24] ss:$16 sps:$4 sm:$0xff]   ;;  %v3022_v34 = vmov 1  }
  0x15   :  { %804 = vmatprep.subr.bf16.mxu0 %v2257_v2  ;;  %845 = vmatprep.subr.bf16.mxu1 %v2259_v3  ;;  %v2271_v7 = vld [vmem:[#allocation2 + $0x2c] ss:$16 sps:$4 sm:$0xff]   ;;  %v2273_v8 = vld [vmem:[#allocation2 + $0x20] ss:$16 sps:$4 sm:$0xff]   ;;  %v2276_v9 = vld [vmem:[#allocation2 + $0x28] ss:$16 sps:$4 sm:$0xff]  }
  0x16   :  { %805 = vmatpush1.bf16.msra.mxu0 %v2262_v4  ;;  %846 = vmatpush1.bf16.msra.mxu1 %v2264_v5  ;;  %v2279_v10 = vld [vmem:[#allocation2 + $0x44] ss:$16 sps:$4 sm:$0xff]   ;;  %v2281_v11 = vld [vmem:[#allocation2 + $0x4c] ss:$16 sps:$4 sm:$0xff]   ;;  %v2283_v12 = vld [vmem:[#allocation2 + $0x40] ss:$16 sps:$4 sm:$0xff]  }
  0x17   :  { %806 = vmatprep.subr.bf16.mxu0 %v2267_v6  ;;  %847 = vmatprep.subr.bf16.mxu1 %v2271_v7  ;;  %v2285_v13 = vld [vmem:[#allocation2 + $0x48] ss:$16 sps:$4 sm:$0xff]   ;;  %v2289_v14 = vld [vmem:[#allocation2 + $0x64] ss:$16 sps:$4 sm:$0xff]   ;;  %v2293_v15 = vld [vmem:[#allocation2 + $0x6c] ss:$16 sps:$4 sm:$0xff]  }
  0x18   :  { %v2295_v16 = vld [vmem:[#allocation2 + $0x60] ss:$16 sps:$4 sm:$0xff]   ;;  %v2299_v17 = vld [vmem:[#allocation2 + $0x68] ss:$16 sps:$4 sm:$0xff]   ;;  %v2301_v18 = vld [vmem:[#allocation2 + $0x84] ss:$16 sps:$4 sm:$0xff]  }
  0x19   :  { %v2305_v19 = vld [vmem:[#allocation2 + $0x8c] ss:$16 sps:$4 sm:$0xff]   ;;  %v2307_v20 = vld [vmem:[#allocation2 + $0x80] ss:$16 sps:$4 sm:$0xff]   ;;  %v2309_v21 = vld [vmem:[#allocation2 + $0x88] ss:$16 sps:$4 sm:$0xff]  }
  0x1a   :  { %807 = vmatpush1.bf16.msra.mxu0 %v2273_v8  ;;  %848 = vmatpush1.bf16.msra.mxu1 %v2276_v9  ;;  %v2313_v22 = vld [vmem:[#allocation2 + $0xa4] ss:$16 sps:$4 sm:$0xff]   ;;  %v2317_v23 = vld [vmem:[#allocation2 + $0xac] ss:$16 sps:$4 sm:$0xff]   ;;  %v2321_v24 = vld [vmem:[#allocation2 + $0xa0] ss:$16 sps:$4 sm:$0xff]  }
  0x1b   :  { %808 = vmatprep.subr.bf16.mxu0 %v2279_v10  ;;  %849 = vmatprep.subr.bf16.mxu1 %v2281_v11  ;;  %v2323_v25 = vld [vmem:[#allocation2 + $0xa8] ss:$16 sps:$4 sm:$0xff]   ;;  %v2327_v26 = vld [vmem:[#allocation2 + $0xc4] ss:$16 sps:$4 sm:$0xff]   ;;  %v2329_v27 = vld [vmem:[#allocation2 + $0xcc] ss:$16 sps:$4 sm:$0xff]  }
  0x1c   :  { %v38_v28 = vld [vmem:[%s3011_s0] sm:$0xff]  ;;  %v2338_v30 = vld [vmem:[#allocation2 + $0xc8] ss:$16 sps:$4 sm:$0xff]   ;;  %v2344_v32 = vld [vmem:[#allocation2 + $0xec] ss:$16 sps:$4 sm:$0xff]   ;;  %v83_v39 = vshrl.u32 %v82_v38, 7 }
  0x1d   :  { %381 = vperm.xlu1 %1935, %v38_v28   ;;  %108 = vperm.xlu0 %1933, %v38_v28   ;;  %v2336_v29 = vld [vmem:[#allocation2 + $0xc0] ss:$16 sps:$4 sm:$0xff]   ;;  %v2342_v31 = vld [vmem:[#allocation2 + $0xe4] ss:$16 sps:$4 sm:$0xff]   ;;  %v2352_v36 = vld [vmem:[#allocation2 + $0xe8] ss:$16 sps:$4 sm:$0xff]  }
  0x1e   :  { %809 = vmatpush1.bf16.msra.mxu0 %v2283_v12  ;;  %850 = vmatpush1.bf16.msra.mxu1 %v2285_v13  ;;  %v2350_v35 = vld [vmem:[#allocation2 + $0xe0] ss:$16 sps:$4 sm:$0xff]   ;;  %3091 = vst [vmem:[#allocation8_spill] sm:$0xff] %v2352_v36  ;;  %v39_v37 = vld [vmem:[%s3011_s0 + $0x8] sm:$0xff]  ;;  %v84_v40 = vsub.s32 0, %v83_v39  ;;  %v154_v42 = vsub.s32 4, %v83_v39 }
  0x1f   :  { %810 = vmatprep.subr.bf16.mxu0 %v2289_v14  ;;  %851 = vmatprep.subr.bf16.mxu1 %v2293_v15  ;;  %3090 = vst [vmem:[#allocation7_spill] sm:$0xff] %v2350_v35  ;;  %v46_v41 = vld [vmem:[%s3012_s1] sm:$0xff]  ;;  %v88_v43 = vsub.s32 1, %v83_v39  ;;  %v286_v46 = vsub.s32 5, %v83_v39  ;;  %v92_v47 = vsub.s32 2, %v83_v39  ;;  %v2410_v49 = vld [vmem:[%s3012_s1 + $0x8] sm:$0xff] }
  0x20   :  { %v151_v44 = vrot.slane %v46_v41, %v84_v40  ;;  %v155_v45 = vrot.slane %v46_v41, %v154_v42  ;;  %v418_v50 = vsub.s32 6, %v83_v39  ;;  %v80_v53 = vld [vmem:[%s3014_s3] sm:$0xf]  ;;  %v163_v57 = vrot.slane %v2410_v49, %v154_v42 }
  0x21   :  { %1936 = vset.pattern.permute.xlu1 %v3020_v33  ;;  %1934 = vset.pattern.permute.xlu0 %v3022_v34  ;;  %v283_v52 = vrot.slane %v46_v41, %v88_v43  ;;  %v287_v55 = vrot.slane %v46_v41, %v286_v46  ;;  %v415_v56 = vrot.slane %v46_v41, %v92_v47  ;;  %v550_v38 = vsub.s32 7, %v83_v39 }
  0x22   :  { %811 = vmatpush1.bf16.msra.mxu0 %v2295_v16  ;;  %852 = vmatpush1.bf16.msra.mxu1 %v2299_v17  ;;  %v2412_v51 = vrot.slane %v151_v44, %v84_v40  ;;  %v2417_v54 = vrot.slane %v155_v45, %v84_v40  ;;  %v419_v58 = vrot.slane %v46_v41, %v418_v50  ;;  %v96_v44 = vsub.s32 3, %v83_v39 }
  0x23   :  { %812 = vmatprep.subr.bf16.mxu0 %v2301_v18  ;;  %853 = vmatprep.subr.bf16.mxu1 %v2305_v19  ;;  %v2420_v59 = vrot.slane %v80_v53, %v84_v40  ;;  %v2423_v61 = vrot.slane %v283_v52, %v88_v43  ;;  %v2425_v62 = vrot.slane %v80_v53, %v88_v43  ;;  %vm2204_vm0 = vmmov 0  }
  0x24   :  { %513 = vperm.xlu1 %1936, %v38_v28   ;;  %249 = vperm.xlu0 %1934, %v38_v28   ;;  %3092 = vst [vmem:[#allocation9_spill] sm:$0xff] %v2412_v51  ;;  %3093 = vst [vmem:[#allocation10_spill] sm:$0xff] %v2417_v54  ;;  %v2428_v28 = vrot.slane %v287_v55, %v88_v43  ;;  %v159_v45 = vrot.slane %v2410_v49, %v84_v40 }
  0x25   :  { %3094 = vst [vmem:[#allocation11_spill] sm:$0xff] %v2420_v59  ;;  %3095 = vst [vmem:[#allocation12_spill] sm:$0xff] %v2423_v61  ;;  %v295_v42 = vrot.slane %v2410_v49, %v286_v46 }
  0x26   :  { %813 = vmatpush1.bf16.msra.mxu0 %v2307_v20  ;;  %854 = vmatpush1.bf16.msra.mxu1 %v2309_v21  ;;  %3096 = vst [vmem:[#allocation13_spill] sm:$0xff] %v2425_v62  ;;  %3097 = vst [vmem:[#allocation14_spill] sm:$0xff] %v2428_v28  ;;  %v2445_v46 = vrot.slane %v159_v45, %v84_v40 }
  0x27   :  { %814 = vmatprep.subr.bf16.mxu0 %v2313_v22  ;;  %855 = vmatprep.subr.bf16.mxu1 %v2317_v23 }
  0x28   :  { %1937 = vset.pattern.permute.xlu1 %v3024_v0  ;;  %253 = vperm.xlu0 %1934, %v39_v37  }
  0x29   :  { %113 = vperm.xlu1 %1937, %v39_v37  }
  0x2a   :  { %815 = vmatpush1.bf16.msra.mxu0 %v2321_v24  ;;  %856 = vmatpush1.bf16.msra.mxu1 %v2323_v25 }
  0x2b   :  { %816 = vmatprep.subr.bf16.mxu0 %v2327_v26  ;;  %857 = vmatprep.subr.bf16.mxu1 %v2329_v27 }
  0x2c   :  { %1939 = vset.pattern.permute.xlu0 %v3020_v33  ;;  %v2434_v33 = vrot.slane %v415_v56, %v92_v47 }
  0x2d   :  { %1938 = vset.pattern.permute.xlu1 %v3018_v1  ;;  %517 = vperm.xlu0 %1939, %v39_v37  }
  0x2e   :  { %817 = vmatpush1.bf16.msra.mxu0 %v2336_v29  ;;  %858 = vmatpush1.bf16.msra.mxu1 %v2338_v30  ;;  %3099 = vst [vmem:[#allocation16_spill] sm:$0xff] %v2434_v33 }
  0x2f   :  { %818 = vmatprep.subr.bf16.mxu0 %v2342_v31  ;;  %859 = vmatprep.subr.bf16.mxu1 %v2344_v32 }
  0x30   :  { %385 = vperm.xlu1 %1938, %v39_v37  }
  0x31   :  { %1942 = vset.pattern.permute.xlu0 %v3018_v1  ;;  %v2431_v1 = vrot.slane %v163_v57, %v84_v40  ;;  %v427_v57 = vrot.slane %v2410_v49, %v418_v50  ;;  %v423_v50 = vrot.slane %v2410_v49, %v92_v47  ;;  %v2458_v40 = vrot.slane %v80_v53, %v92_v47 }
  0x32   :  { %819 = vmatpush1.bf16.msra.mxu0 %v2350_v35  ;;  %860 = vmatpush1.bf16.msra.mxu1 %v2352_v36 }
  0x33   :  { %915 = vmatprep.subr.bf16.mxu0 %v2257_v2  ;;  %956 = vmatprep.subr.bf16.mxu1 %v2259_v3  ;;  %3098 = vst [vmem:[#allocation15_spill] sm:$0xff] %v2431_v1  ;;  %3104 = vst [vmem:[#allocation21_spill] sm:$0xff] %v2458_v40  ;;  %v2460_v45 = vrot.slane %v427_v57, %v92_v47 }
  0x34   :  { %1940 = vset.pattern.permute.xlu1 %v3024_v0 }
  0x35   :  { %837 = vmatmul.mubr.bf16.vlgmr.msra.gmra.mrb[0].mxu0 %v3024_v0  ;;  %878 = vmatmul.mubr.bf16.vlgmr.msra.gmra.mrb[0].mxu1 %v3024_v0  ;;  %3105 = vst [vmem:[#allocation22_spill] sm:$0xff] %v2460_v45 }
  0x36   :  { %916 = vmatpush1.bf16.msra.mxu0 %v2262_v4  ;;  %957 = vmatpush1.bf16.msra.mxu1 %v2264_v5 }
  0x37   :  { %917 = vmatprep.subr.bf16.mxu0 %v2267_v6  ;;  %958 = vmatprep.subr.bf16.mxu1 %v2271_v7 }
  0x38   :  { %947 = vmatprep.mubr.bf16.mxu0 %v3024_v0  ;;  %988 = vmatprep.mubr.bf16.mxu1 %v3024_v0  ;;  %v547_v0 = vrot.slane %v46_v41, %v96_v44 }
  0x3a   :  { %918 = vmatpush1.bf16.msra.mxu0 %v2273_v8  ;;  %959 = vmatpush1.bf16.msra.mxu1 %v2276_v9 }
  0x3b   :  { %919 = vmatprep.subr.bf16.mxu0 %v2279_v10  ;;  %960 = vmatprep.subr.bf16.mxu1 %v2281_v11 }
  0x3e   :  { %920 = vmatpush1.bf16.msra.mxu0 %v2283_v12  ;;  %961 = vmatpush1.bf16.msra.mxu1 %v2285_v13 }
  0x3f   :  { %921 = vmatprep.subr.bf16.mxu0 %v2289_v14  ;;  %962 = vmatprep.subr.bf16.mxu1 %v2293_v15 }
  0x42   :  { %922 = vmatpush1.bf16.msra.mxu0 %v2295_v16  ;;  %963 = vmatpush1.bf16.msra.mxu1 %v2299_v17 }
  0x43   :  { %923 = vmatprep.subr.bf16.mxu0 %v2301_v18  ;;  %964 = vmatprep.subr.bf16.mxu1 %v2305_v19 }
  0x46   :  { %924 = vmatpush1.bf16.msra.mxu0 %v2307_v20  ;;  %965 = vmatpush1.bf16.msra.mxu1 %v2309_v21 }
  0x47   :  { %925 = vmatprep.subr.bf16.mxu0 %v2313_v22  ;;  %966 = vmatprep.subr.bf16.mxu1 %v2317_v23 }
  0x4a   :  { %926 = vmatpush1.bf16.msra.mxu0 %v2321_v24  ;;  %967 = vmatpush1.bf16.msra.mxu1 %v2323_v25 }
  0x4b   :  { %927 = vmatprep.subr.bf16.mxu0 %v2327_v26  ;;  %968 = vmatprep.subr.bf16.mxu1 %v2329_v27 }
  0x4e   :  { %928 = vmatpush1.bf16.msra.mxu0 %v2336_v29  ;;  %969 = vmatpush1.bf16.msra.mxu1 %v2338_v30 }
  0x4f   :  { %929 = vmatprep.subr.bf16.mxu0 %v2342_v31  ;;  %970 = vmatprep.subr.bf16.mxu1 %v2344_v32 }
  0x52   :  { %930 = vmatpush1.bf16.msra.mxu0 %v2350_v35  ;;  %971 = vmatpush1.bf16.msra.mxu1 %v2352_v36  ;;  %v2452_v36 = vrot.slane %v547_v0, %v96_v44 }
  0x53   :  { %1026 = vmatprep.subr.bf16.mxu0 %v2257_v2  ;;  %1067 = vmatprep.subr.bf16.mxu1 %v2259_v3  ;;  %v551_v3 = vrot.slane %v46_v41, %v550_v38  ;;  %v2443_v2 = vrot.slane %v80_v53, %v96_v44 }
  0x55   :  { %3101 = vst [vmem:[#allocation18_spill] sm:$0xff] %v2443_v2 }
  0x9c   :  { %v109_v48 = vpop.permute.xlu0 %108  ;;  %v382_v55 = vpop.permute.xlu1 %381 }
  0x9d   :  { %v184_v60 = vmul.f32 %v2412_v51, %v109_v48  ;;  %v185_v63 = vmul.f32 %v2417_v54, %v109_v48  ;;  %v2438_v51 = vrot.slane %v419_v58, %v92_v47  ;;  %v187_v56 = vmul.f32 %v2431_v1, %v109_v48 }
  0x9e   :  { %v291_v58 = vrot.slane %v2410_v49, %v88_v43  ;;  %v186_v0 = vmul.f32 %v2445_v46, %v109_v48  ;;  %v451_v57 = vmul.f32 %v2460_v45, %v382_v55 }
  0x9f   :  { %v216_v52 = vadd.f32 %v184_v60, %v2420_v59  ;;  %3100 = vst [vmem:[#allocation17_spill] sm:$0xff] %v2438_v51  ;;  %v217_v54 = vadd.f32 %v185_v63, %v2425_v62  ;;  %v2448_v60 = vrot.slane %v295_v42, %v88_v43  ;;  %v449_v63 = vmul.f32 %v2438_v51, %v382_v55 }
  0xa0   :  { %v219_v42 = vadd.f32 %v187_v56, %v2443_v2  ;;  %v2470_v51 = vrot.slane %v423_v50, %v92_v47 }
  0xa1   :  { %3102 = vst [vmem:[#allocation19_spill] sm:$0xff] %v2448_v60 }
  0xa3   :  { %v250_v37 = vpop.permute.xlu0 %249  ;;  %v514_v1 = vpop.permute.xlu1 %513 }
  0xa4   :  { %v316_v34 = vmul.f32 %v2423_v61, %v250_v37  ;;  %v317_v39 = vmul.f32 %v2428_v28, %v250_v37  ;;  %v448_v61 = vmul.f32 %v2434_v33, %v382_v55  ;;  %v2455_v28 = vrot.slane %v551_v3, %v96_v44 }
  0xa5   :  { %v319_v33 = vmul.f32 %v2448_v60, %v250_v37  ;;  %v580_v3 = vmul.f32 %v2452_v36, %v514_v1  ;;  %v218_v60 = vadd.f32 %v186_v0, %v2458_v40 }
  0xa6   :  { %v348_v59 = vadd.f32 %v316_v34, %v216_v52  ;;  %v349_v41 = vadd.f32 %v317_v39, %v217_v54  ;;  %3103 = vst [vmem:[#allocation20_spill] sm:$0xff] %v2455_v28  ;;  %v559_v34 = vrot.slane %v2410_v49, %v550_v38  ;;  %v2466_v52 = vrot.slane %v291_v58, %v88_v43 }
  0xa7   :  { %v581_v53 = vmul.f32 %v2455_v28, %v514_v1  ;;  %v351_v56 = vadd.f32 %v319_v33, %v219_v42  ;;  %v555_v43 = vrot.slane %v2410_v49, %v96_v44 }
  0xa8   :  { %3106 = vst [vmem:[#allocation23_spill] sm:$0xff] %v2466_v52  ;;  %v480_v54 = vadd.f32 %v448_v61, %v348_v59  ;;  %v481_v39 = vadd.f32 %v449_v63, %v349_v41  ;;  %v2473_v2 = vrot.slane %v559_v34, %v96_v44  ;;  %v318_v38 = vmul.f32 %v2466_v52, %v250_v37 }
  0xa9   :  { %v483_v50 = vadd.f32 %v451_v57, %v351_v56  ;;  %v450_v34 = vmul.f32 %v2470_v51, %v382_v55  ;;  %v2480_v37 = vrot.slane %v555_v43, %v96_v44 }
  0xaa   :  { %v612_v48 = vadd.f32 %v580_v3, %v480_v54  ;;  %v613_v58 = vadd.f32 %v581_v53, %v481_v39  ;;  %v583_v45 = vmul.f32 %v2473_v2, %v514_v1  ;;  %v350_v40 = vadd.f32 %v318_v38, %v218_v60 }
  0xac   :  { %v615_v39 = vadd.f32 %v583_v45, %v483_v50  ;;  %v482_v53 = vadd.f32 %v450_v34, %v350_v40  ;;  %v3107_v34 = vmov 0  }
 0x108   :  { %v838_v59 = vpop.f32.mrb[0].mxu0  ;;  %v879_v61 = vpop.f32.mrb[0].mxu1 }
 0x109   :  { %v886_v63 = vadd.f32 %v838_v59, %v612_v48  ;;  %v840_v41 = vpop.f32.mrb[1].mxu0  ;;  %v881_v28 = vpop.f32.mrb[1].mxu1  ;;  %v582_v48 = vmul.f32 %v2480_v37, %v514_v1 }
 0x10a   :  { %v887_v47 = vadd.f32 %v840_v41, %v613_v58  ;;  %v842_v33 = vpop.f32.mrb[2].mxu0  ;;  %v883_v42 = vpop.f32.mrb[2].mxu1  ;;  %v889_v57 = vadd.f32 %v881_v28, %v615_v39  ;;  %v3111_v39 = vmov 1  }
 0x10b   :  { %v1822_v0 = vmul.f32 -1.442695, %v886_v63  ;;  %v843_v54 = vpop.f32.mrb[3].mxu0  ;;  %v884_v49 = vpop.f32.mrb[3].mxu1  ;;  %v614_v56 = vadd.f32 %v582_v48, %v482_v53  ;;  %v3112_v53 = vmov 3  }
 0x10c   :  { %v1823_v3 = vmul.f32 -1.442695, %v887_v47  ;;  %v1824_v59 = vmul.f32 -1.442695, %v889_v57  ;;  %v3109_v54 = vld [vmem:[#allocation5_spill] sm:$0xff]  ;;  %v3110_v49 = vld [vmem:[#allocation6_spill] sm:$0xff]  ;;  %v114_v48 = vpop.permute.xlu1 %113 }
 0x10d   :  { %2012 = vpow2.f32 %v1822_v0  ;;  %v888_v58 = vadd.f32 %v879_v61, %v614_v56  ;;  %v3108_v0 = vld [vmem:[#allocation8_spill] sm:$0xff]  ;;  %v3113_v57 = vld [vmem:[#allocation9_spill] sm:$0xff] }
 0x10e   :  { %2014 = vpow2.f32 %v1823_v3  ;;  %v40_v3 = vld [vmem:[%s3011_s0 + $0x10] sm:$0xff]  ;;  %v188_v56 = vmul.f32 %v3113_v57, %v114_v48 }
 0x10f   :  { %2016 = vpow2.f32 %v1824_v59  ;;  %118 = vperm.xlu1 %1940, %v40_v3   ;;  %389 = vperm.xlu0 %1942, %v40_v3   ;;  %v3114_v59 = vld [vmem:[#allocation10_spill] sm:$0xff] }
 0x110   :  { %2018 = vtanh.f32 %v888_v58  ;;  %v189_v58 = vmul.f32 %v3114_v59, %v114_v48  ;;  %v3121_v59 = vld [vmem:[#allocation18_spill] sm:$0xff] }
 0x113   :  { %1941 = vset.pattern.permute.xlu1 %v3111_v39  ;;  %1945 = vset.pattern.permute.xlu0 %v3111_v39 }
 0x114   :  { %257 = vperm.xlu1 %1941, %v40_v3  }
 0x117   :  { %v2013_v41 = vpop.eup %2012 }
 0x118   :  { %v2015_v33 = vpop.eup %2014  ;;  %v893_v55 = vadd.f32 1.0, %v2013_v41  ;;  %1943 = vset.pattern.permute.xlu1 %v3112_v53  ;;  %v254_v41 = vpop.permute.xlu0 %253 }
 0x119   :  { %v899_v44 = vadd.f32 1.0, %v2015_v33  ;;  %v2017_v60 = vpop.eup %2016  ;;  %521 = vperm.xlu1 %1943, %v40_v3   ;;  %v3115_v33 = vld [vmem:[#allocation11_spill] sm:$0xff] }
 0x11a   :  { %2020 = vrcp.f32 %v893_v55  ;;  %v2019_v38 = vpop.eup %2018  ;;  %v906_v40 = vadd.f32 1.0, %v2017_v60  ;;  %v220_v55 = vadd.f32 %v188_v56, %v3115_v33 }
 0x11b   :  { %2022 = vrcp.f32 %v899_v44  ;;  %v3116_v44 = vld [vmem:[#allocation12_spill] sm:$0xff] }
 0x11c   :  { %2024 = vrcp.f32 %v906_v40  ;;  %v320_v60 = vmul.f32 %v3116_v44, %v254_v41  ;;  %v3118_v40 = vld [vmem:[#allocation15_spill] sm:$0xff]  ;;  %v518_v57 = vpop.permute.xlu0 %517  ;;  %v190_v44 = vmul.f32 %v2445_v46, %v114_v48 }
 0x11d   :  { %1944 = vset.pattern.permute.xlu1 %v3107_v34 }
 0x124   :  { %v2021_v43 = vpop.eup %2020 }
 0x125   :  { %v2023_v63 = vpop.eup %2022  ;;  %v910_v45 = vmul.f32 %v2021_v43, %v2019_v38  ;;  %v221_v38 = vadd.f32 %v189_v58, %v2425_v62  ;;  %v3117_v43 = vld [vmem:[#allocation14_spill] sm:$0xff]  ;;  %v584_v58 = vmul.f32 %v2452_v36, %v518_v57  ;;  %v3123_v62 = vld [vmem:[#allocation20_spill] sm:$0xff] }
 0x126   :  { %v909_v47 = vmul.f32 0.0, %v2023_v63  ;;  %v2025_v28 = vpop.eup %2024  ;;  %v321_v63 = vmul.f32 %v3117_v43, %v254_v41 }
 0x128   :  { %v2483_v1 = vadd.f32 %v910_v45, %v909_v47  ;;  %v386_v45 = vpop.permute.xlu1 %385  ;;  %v191_v47 = vmul.f32 %v3118_v40, %v114_v48  ;;  %v353_v39 = vadd.f32 %v321_v63, %v221_v38  ;;  %v3124_v40 = vld [vmem:[#allocation22_spill] sm:$0xff] }
 0x12a   :  { %2026 = vtanh.f32 %v2483_v1  ;;  %v223_v53 = vadd.f32 %v191_v47, %v3121_v59 }
 0x134   :  { %v2027_v61 = vpop.eup %2026 }
 0x135   :  { %v913_v50 = vmul.f32 %v2027_v61, %v2025_v28  ;;  %v3119_v28 = vld [vmem:[#allocation16_spill] sm:$0xff] }
 0x136   :  { %v452_v61 = vmul.f32 %v3119_v28, %v386_v45 }
 0x137   :  { %v914_v42 = vpack.c.bf16 %v913_v50, %v913_v50  ;;  %v352_v50 = vadd.f32 %v320_v60, %v220_v55  ;;  %v3125_v55 = vld [vmem:[#allocation21_spill] sm:$0xff] }
 0x138   :  { %v222_v60 = vadd.f32 %v190_v44, %v3125_v55 }
 0x139   :  { %948 = vmatmul.mubr.bf16.vlgmr.msra.gmra.mrb[4].mxu0 %v914_v42  ;;  %989 = vmatmul.mubr.bf16.vlgmr.msra.gmra.mrb[4].mxu1 %v914_v42  ;;  %v3120_v42 = vld [vmem:[#allocation17_spill] sm:$0xff]  ;;  %v484_v33 = vadd.f32 %v452_v61, %v352_v50 }
 0x13a   :  { %1027 = vmatpush1.bf16.msra.mxu0 %v2262_v4  ;;  %1068 = vmatpush1.bf16.msra.mxu1 %v2264_v5  ;;  %v453_v3 = vmul.f32 %v3120_v42, %v386_v45  ;;  %v322_v42 = vmul.f32 %v2466_v52, %v254_v41 }
 0x13b   :  { %1028 = vmatprep.subr.bf16.mxu0 %v2267_v6  ;;  %1069 = vmatprep.subr.bf16.mxu1 %v2271_v7  ;;  %v616_v38 = vadd.f32 %v584_v58, %v484_v33 }
 0x13c   :  { %1058 = vmatprep.mubr.bf16.mxu0 %v3107_v34  ;;  %1099 = vmatprep.mubr.bf16.mxu1 %v3107_v34  ;;  %v485_v43 = vadd.f32 %v453_v3, %v353_v39  ;;  %v587_v39 = vmul.f32 %v2473_v2, %v518_v57 }
 0x13e   :  { %1029 = vmatpush1.bf16.msra.mxu0 %v2273_v8  ;;  %1070 = vmatpush1.bf16.msra.mxu1 %v2276_v9 }
 0x13f   :  { %1030 = vmatprep.subr.bf16.mxu0 %v2279_v10  ;;  %1071 = vmatprep.subr.bf16.mxu1 %v2281_v11 }
 0x142   :  { %1031 = vmatpush1.bf16.msra.mxu0 %v2283_v12  ;;  %1072 = vmatpush1.bf16.msra.mxu1 %v2285_v13 }
 0x143   :  { %1032 = vmatprep.subr.bf16.mxu0 %v2289_v14  ;;  %1073 = vmatprep.subr.bf16.mxu1 %v2293_v15 }
 0x146   :  { %1033 = vmatpush1.bf16.msra.mxu0 %v2295_v16  ;;  %1074 = vmatpush1.bf16.msra.mxu1 %v2299_v17 }
 0x147   :  { %1034 = vmatprep.subr.bf16.mxu0 %v2301_v18  ;;  %1075 = vmatprep.subr.bf16.mxu1 %v2305_v19 }
 0x14a   :  { %1035 = vmatpush1.bf16.msra.mxu0 %v2307_v20  ;;  %1076 = vmatpush1.bf16.msra.mxu1 %v2309_v21 }
 0x14b   :  { %1036 = vmatprep.subr.bf16.mxu0 %v2313_v22  ;;  %1077 = vmatprep.subr.bf16.mxu1 %v2317_v23 }
 0x14e   :  { %1037 = vmatpush1.bf16.msra.mxu0 %v2321_v24  ;;  %1078 = vmatpush1.bf16.msra.mxu1 %v2323_v25 }
 0x14f   :  { %1038 = vmatprep.subr.bf16.mxu0 %v2327_v26  ;;  %1079 = vmatprep.subr.bf16.mxu1 %v2329_v27 }
 0x152   :  { %1039 = vmatpush1.bf16.msra.mxu0 %v2336_v29  ;;  %1080 = vmatpush1.bf16.msra.mxu1 %v2338_v30 }
 0x153   :  { %1040 = vmatprep.subr.bf16.mxu0 %v2342_v31  ;;  %1081 = vmatprep.subr.bf16.mxu1 %v2344_v32 }
 0x156   :  { %1041 = vmatpush1.bf16.msra.mxu0 %v2350_v35  ;;  %1082 = vmatpush1.bf16.msra.mxu1 %v3108_v0  ;;  %v455_v0 = vmul.f32 %v3124_v40, %v386_v45  ;;  %v454_v40 = vmul.f32 %v2470_v51, %v386_v45 }
 0x157   :  { %1137 = vmatprep.subr.bf16.mxu0 %v3109_v54  ;;  %1178 = vmatprep.subr.bf16.mxu1 %v3110_v49  ;;  %v3122_v49 = vld [vmem:[#allocation19_spill] sm:$0xff]  ;;  %v585_v54 = vmul.f32 %v3123_v62, %v518_v57 }
 0x158   :  { %v323_v56 = vmul.f32 %v3122_v49, %v254_v41 }
 0x159   :  { %v617_v59 = vadd.f32 %v585_v54, %v485_v43  ;;  %v586_v43 = vmul.f32 %v2480_v37, %v518_v57 }
 0x15a   :  { %v355_v28 = vadd.f32 %v323_v56, %v223_v53  ;;  %v354_v56 = vadd.f32 %v322_v42, %v222_v60 }
 0x15c   :  { %v487_v50 = vadd.f32 %v455_v0, %v355_v28  ;;  %v486_v54 = vadd.f32 %v454_v40, %v354_v56  ;;  %v3130_v56 = vmov 2  }
 0x15e   :  { %v619_v33 = vadd.f32 %v587_v39, %v487_v50 }
 0x20c   :  { %v949_v63 = vpop.f32.mrb[4].mxu0  ;;  %v990_v47 = vpop.f32.mrb[4].mxu1 }
 0x20d   :  { %v997_v49 = vadd.f32 %v949_v63, %v616_v38  ;;  %v951_v35 = vpop.f32.mrb[5].mxu0  ;;  %v992_v48 = vpop.f32.mrb[5].mxu1 }
 0x20e   :  { %v998_v61 = vadd.f32 %v951_v35, %v617_v59  ;;  %v953_v3 = vpop.f32.mrb[6].mxu0  ;;  %v994_v62 = vpop.f32.mrb[6].mxu1  ;;  %v1000_v58 = vadd.f32 %v992_v48, %v619_v33  ;;  %v618_v35 = vadd.f32 %v586_v43, %v486_v54  ;;  %v3133_v54 = vld [vmem:[#allocation9_spill] sm:$0xff] }
 0x20f   :  { %v1825_v53 = vmul.f32 -1.442695, %v997_v49  ;;  %v954_v44 = vpop.f32.mrb[7].mxu0  ;;  %v995_v55 = vpop.f32.mrb[7].mxu1  ;;  %v3129_v3 = vld [vmem:[#allocation6_spill] sm:$0xff] }
 0x210   :  { %v1826_v41 = vmul.f32 -1.442695, %v998_v61  ;;  %v1827_v0 = vmul.f32 -1.442695, %v1000_v58  ;;  %v999_v59 = vadd.f32 %v990_v47, %v618_v35  ;;  %v3131_v44 = vmov 3   ;;  %v119_v33 = vpop.permute.xlu1 %118  ;;  %v3134_v58 = vld [vmem:[#allocation10_spill] sm:$0xff] }
 0x211   :  { %2028 = vpow2.f32 %v1825_v53  ;;  %v41_v53 = vld [vmem:[%s3011_s0 + $0x18] sm:$0xff]  ;;  %v192_v43 = vmul.f32 %v3133_v54, %v119_v33  ;;  %v193_v35 = vmul.f32 %v3134_v58, %v119_v33  ;;  %v3143_v58 = vld [vmem:[#allocation19_spill] sm:$0xff] }
 0x212   :  { %2030 = vpow2.f32 %v1826_v41  ;;  %123 = vperm.xlu1 %1944, %v41_v53   ;;  %261 = vperm.xlu0 %1945, %v41_v53   ;;  %v3132_v41 = vmov 1  }
 0x213   :  { %2032 = vpow2.f32 %v1827_v0 }
 0x214   :  { %2034 = vtanh.f32 %v999_v59  ;;  %v258_v0 = vpop.permute.xlu1 %257  ;;  %v3135_v59 = vld [vmem:[#allocation11_spill] sm:$0xff] }
 0x216   :  { %1946 = vset.pattern.permute.xlu1 %v3130_v56  ;;  %1948 = vset.pattern.permute.xlu0 %v3107_v34 }
 0x217   :  { %393 = vperm.xlu1 %1946, %v41_v53  }
 0x21b   :  { %v2029_v28 = vpop.eup %2028  ;;  %1947 = vset.pattern.permute.xlu1 %v3131_v44 }
 0x21c   :  { %v2031_v38 = vpop.eup %2030  ;;  %v1004_v62 = vadd.f32 1.0, %v2029_v28  ;;  %525 = vperm.xlu1 %1947, %v41_v53   ;;  %v224_v28 = vadd.f32 %v192_v43, %v3135_v59  ;;  %v3142_v53 = vld [vmem:[#allocation18_spill] sm:$0xff]  ;;  %v327_v43 = vmul.f32 %v3143_v58, %v258_v0 }
 0x21d   :  { %v1010_v49 = vadd.f32 1.0, %v2031_v38  ;;  %v2033_v45 = vpop.eup %2032  ;;  %v3136_v38 = vld [vmem:[#allocation12_spill] sm:$0xff] }
 0x21e   :  { %2036 = vrcp.f32 %v1004_v62  ;;  %v2035_v42 = vpop.eup %2034  ;;  %v1017_v40 = vadd.f32 1.0, %v2033_v45  ;;  %v324_v62 = vmul.f32 %v3136_v38, %v258_v0  ;;  %v194_v38 = vmul.f32 %v2445_v46, %v119_v33 }
 0x21f   :  { %2038 = vrcp.f32 %v1010_v49  ;;  %v3137_v49 = vld [vmem:[#allocation13_spill] sm:$0xff] }
 0x220   :  { %2040 = vrcp.f32 %v1017_v40  ;;  %1949 = vset.pattern.permute.xlu1 %v3132_v41  ;;  %v225_v45 = vadd.f32 %v193_v35, %v3137_v49  ;;  %v3144_v49 = vld [vmem:[#allocation20_spill] sm:$0xff] }
 0x228   :  { %v2037_v55 = vpop.eup %2036 }
 0x229   :  { %v2039_v60 = vpop.eup %2038  ;;  %v1021_v63 = vmul.f32 %v2037_v55, %v2035_v42  ;;  %v3138_v42 = vld [vmem:[#allocation14_spill] sm:$0xff] }
 0x22a   :  { %v1020_v57 = vmul.f32 %v2039_v60, %v2483_v1  ;;  %v2041_v47 = vpop.eup %2040  ;;  %v3128_v1 = vld [vmem:[#allocation5_spill] sm:$0xff]  ;;  %v325_v55 = vmul.f32 %v3138_v42, %v258_v0  ;;  %v390_v60 = vpop.permute.xlu0 %389 }
 0x22c   :  { %v2548_v48 = vadd.f32 %v1021_v63, %v1020_v57  ;;  %v3139_v63 = vld [vmem:[#allocation15_spill] sm:$0xff]  ;;  %v3140_v57 = vld [vmem:[#allocation16_spill] sm:$0xff] }
 0x22d   :  { %v195_v40 = vmul.f32 %v3139_v63, %v119_v33  ;;  %v3145_v63 = vld [vmem:[#allocation22_spill] sm:$0xff] }
 0x22e   :  { %2042 = vtanh.f32 %v2548_v48  ;;  %v459_v44 = vmul.f32 %v3145_v63, %v390_v60  ;;  %v458_v63 = vmul.f32 %v2470_v51, %v390_v60 }
 0x22f   :  { %v227_v41 = vadd.f32 %v195_v40, %v3142_v53 }
 0x238   :  { %v2043_v61 = vpop.eup %2042 }
 0x239   :  { %v1024_v50 = vmul.f32 %v2043_v61, %v2041_v47  ;;  %v456_v47 = vmul.f32 %v3140_v57, %v390_v60  ;;  %v356_v61 = vadd.f32 %v324_v62, %v224_v28  ;;  %v359_v57 = vadd.f32 %v327_v43, %v227_v41  ;;  %v3146_v28 = vld [vmem:[#allocation21_spill] sm:$0xff] }
 0x23a   :  { %v226_v62 = vadd.f32 %v194_v38, %v3146_v28 }
 0x23b   :  { %v1025_v39 = vpack.c.bf16 %v1024_v50, %v1024_v50  ;;  %v3141_v50 = vld [vmem:[#allocation17_spill] sm:$0xff]  ;;  %v488_v59 = vadd.f32 %v456_v47, %v356_v61  ;;  %v491_v61 = vadd.f32 %v459_v44, %v359_v57 }
 0x23d   :  { %1059 = vmatmul.mubr.bf16.vlgmr.msra.gmra.mrb[8].mxu0 %v1025_v39  ;;  %1100 = vmatmul.mubr.bf16.vlgmr.msra.gmra.mrb[8].mxu1 %v1025_v39  ;;  %v457_v39 = vmul.f32 %v3141_v50, %v390_v60  ;;  %v326_v50 = vmul.f32 %v2466_v52, %v258_v0 }
 0x23e   :  { %1138 = vmatpush1.bf16.msra.mxu0 %v2262_v4  ;;  %1179 = vmatpush1.bf16.msra.mxu1 %v2264_v5  ;;  %v3126_v4 = vld [vmem:[#allocation7_spill] sm:$0xff]  ;;  %v3127_v5 = vld [vmem:[#allocation8_spill] sm:$0xff] }
 0x23f   :  { %1139 = vmatprep.subr.bf16.mxu0 %v2267_v6  ;;  %1180 = vmatprep.subr.bf16.mxu1 %v2271_v7  ;;  %v358_v43 = vadd.f32 %v326_v50, %v226_v62 }
 0x240   :  { %1169 = vmatprep.mubr.bf16.mxu0 %v3107_v34  ;;  %1210 = vmatprep.mubr.bf16.mxu1 %v3107_v34 }
 0x242   :  { %1140 = vmatpush1.bf16.msra.mxu0 %v2273_v8  ;;  %1181 = vmatpush1.bf16.msra.mxu1 %v2276_v9 }
 0x243   :  { %1141 = vmatprep.subr.bf16.mxu0 %v2279_v10  ;;  %1182 = vmatprep.subr.bf16.mxu1 %v2281_v11 }
 0x246   :  { %1142 = vmatpush1.bf16.msra.mxu0 %v2283_v12  ;;  %1183 = vmatpush1.bf16.msra.mxu1 %v2285_v13 }
 0x247   :  { %1143 = vmatprep.subr.bf16.mxu0 %v2289_v14  ;;  %1184 = vmatprep.subr.bf16.mxu1 %v2293_v15 }
 0x24a   :  { %1144 = vmatpush1.bf16.msra.mxu0 %v2295_v16  ;;  %1185 = vmatpush1.bf16.msra.mxu1 %v2299_v17 }
 0x24b   :  { %1145 = vmatprep.subr.bf16.mxu0 %v2301_v18  ;;  %1186 = vmatprep.subr.bf16.mxu1 %v2305_v19 }
 0x24e   :  { %1146 = vmatpush1.bf16.msra.mxu0 %v2307_v20  ;;  %1187 = vmatpush1.bf16.msra.mxu1 %v2309_v21 }
 0x24f   :  { %1147 = vmatprep.subr.bf16.mxu0 %v2313_v22  ;;  %1188 = vmatprep.subr.bf16.mxu1 %v2317_v23 }
 0x252   :  { %1148 = vmatpush1.bf16.msra.mxu0 %v2321_v24  ;;  %1189 = vmatpush1.bf16.msra.mxu1 %v2323_v25 }
 0x253   :  { %1149 = vmatprep.subr.bf16.mxu0 %v2327_v26  ;;  %1190 = vmatprep.subr.bf16.mxu1 %v2329_v27 }
 0x256   :  { %1150 = vmatpush1.bf16.msra.mxu0 %v2336_v29  ;;  %1191 = vmatpush1.bf16.msra.mxu1 %v2338_v30 }
 0x257   :  { %1151 = vmatprep.subr.bf16.mxu0 %v2342_v31  ;;  %1192 = vmatprep.subr.bf16.mxu1 %v2344_v32 }
 0x25a   :  { %1152 = vmatpush1.bf16.msra.mxu0 %v3126_v4  ;;  %1193 = vmatpush1.bf16.msra.mxu1 %v3127_v5 }
 0x25b   :  { %1248 = vmatprep.subr.bf16.mxu0 %v3128_v1  ;;  %1289 = vmatprep.subr.bf16.mxu1 %v3129_v3  ;;  %v522_v1 = vpop.permute.xlu1 %521  ;;  %v357_v3 = vadd.f32 %v325_v55, %v225_v45 }
 0x25c   :  { %v588_v35 = vmul.f32 %v2452_v36, %v522_v1  ;;  %v589_v54 = vmul.f32 %v3144_v49, %v522_v1 }
 0x25d   :  { %v489_v42 = vadd.f32 %v457_v39, %v357_v3  ;;  %v591_v39 = vmul.f32 %v2473_v2, %v522_v1 }
 0x25e   :  { %v620_v45 = vadd.f32 %v588_v35, %v488_v59 }
 0x25f   :  { %v621_v53 = vadd.f32 %v589_v54, %v489_v42  ;;  %v623_v59 = vadd.f32 %v591_v39, %v491_v61  ;;  %v490_v54 = vadd.f32 %v458_v63, %v358_v43  ;;  %v590_v42 = vmul.f32 %v2480_v37, %v522_v1  ;;  %v3160_v43 = vld [vmem:[#allocation18_spill] sm:$0xff] }
 0x310   :  { %v1060_v55 = vpop.f32.mrb[8].mxu0  ;;  %v1101_v40 = vpop.f32.mrb[8].mxu1 }
 0x311   :  { %v1108_v58 = vadd.f32 %v1060_v55, %v620_v45  ;;  %v1062_v56 = vpop.f32.mrb[9].mxu0  ;;  %v1103_v33 = vpop.f32.mrb[9].mxu1 }
 0x312   :  { %v1109_v47 = vadd.f32 %v1062_v56, %v621_v53  ;;  %v1064_v3 = vpop.f32.mrb[10].mxu0  ;;  %v1105_v49 = vpop.f32.mrb[10].mxu1  ;;  %v1111_v35 = vadd.f32 %v1103_v33, %v623_v59  ;;  %v622_v56 = vadd.f32 %v590_v42, %v490_v54 }
 0x313   :  { %v1828_v41 = vmul.f32 -1.442695, %v1108_v58  ;;  %v1065_v38 = vpop.f32.mrb[11].mxu0  ;;  %v1106_v28 = vpop.f32.mrb[11].mxu1  ;;  %v2616_v3 = vld [vmem:[#allocation2] ss:$16 sps:$4 sm:$0xff]  }
 0x314   :  { %v1829_v0 = vmul.f32 -1.442695, %v1109_v47  ;;  %v1830_v44 = vmul.f32 -1.442695, %v1111_v35  ;;  %v1110_v57 = vadd.f32 %v1101_v40, %v622_v56 }
 0x315   :  { %2044 = vpow2.f32 %v1828_v41  ;;  %v2619_v41 = vld [vmem:[#allocation2 + $0x8] ss:$16 sps:$4 sm:$0xff]  }
 0x316   :  { %2046 = vpow2.f32 %v1829_v0  ;;  %v3161_v0 = vld [vmem:[#allocation19_spill] sm:$0xff] }
 0x317   :  { %2048 = vpow2.f32 %v1830_v44  ;;  %v3162_v44 = vld [vmem:[#allocation20_spill] sm:$0xff] }
 0x318   :  { %2050 = vtanh.f32 %v1110_v57 }
 0x31f   :  { %v2045_v53 = vpop.eup %2044 }
 0x320   :  { %v2047_v45 = vpop.eup %2046  ;;  %v1115_v49 = vadd.f32 1.0, %v2045_v53  ;;  %v3163_v53 = vld [vmem:[#allocation22_spill] sm:$0xff] }
 0x321   :  { %v1121_v58 = vadd.f32 1.0, %v2047_v45  ;;  %v2049_v60 = vpop.eup %2048 }
 0x322   :  { %2052 = vrcp.f32 %v1115_v49  ;;  %v2051_v50 = vpop.eup %2050  ;;  %v1128_v63 = vadd.f32 1.0, %v2049_v60 }
 0x323   :  { %2054 = vrcp.f32 %v1121_v58  ;;  %v3164_v58 = vld [vmem:[#allocation21_spill] sm:$0xff] }
 0x324   :  { %2056 = vrcp.f32 %v1128_v63 }
 0x32c   :  { %v2053_v28 = vpop.eup %2052 }
 0x32d   :  { %v2055_v62 = vpop.eup %2054  ;;  %v1132_v55 = vmul.f32 %v2053_v28, %v2051_v50 }
 0x32e   :  { %v1131_v1 = vmul.f32 %v2055_v62, %v2548_v48  ;;  %v2057_v40 = vpop.eup %2056 }
 0x330   :  { %v2613_v33 = vadd.f32 %v1132_v55, %v1131_v1 }
 0x332   :  { %2058 = vtanh.f32 %v2613_v33 }
 0x33c   :  { %v2059_v47 = vpop.eup %2058 }
 0x33d   :  { %v1135_v61 = vmul.f32 %v2059_v47, %v2057_v40 }
 0x33f   :  { %v1136_v39 = vpack.c.bf16 %v1135_v61, %v1135_v61 }
 0x341   :  { %1170 = vmatmul.mubr.bf16.vlgmr.msra.gmra.mrb[12].mxu0 %v1136_v39  ;;  %1211 = vmatmul.mubr.bf16.vlgmr.msra.gmra.mrb[12].mxu1 %v1136_v39 }
 0x342   :  { %1249 = vmatpush1.bf16.msra.mxu0 %v2616_v3  ;;  %1290 = vmatpush1.bf16.msra.mxu1 %v2619_v41 }
 0x343   :  { %1250 = vmatprep.subr.bf16.mxu0 %v2267_v6  ;;  %1291 = vmatprep.subr.bf16.mxu1 %v2271_v7  ;;  %v2652_v6 = vld [vmem:[#allocation2 + $0x4] ss:$16 sps:$4 sm:$0xff]   ;;  %v2655_v7 = vld [vmem:[#allocation2 + $0xc] ss:$16 sps:$4 sm:$0xff]  }
 0x344   :  { %1280 = vmatprep.mubr.bf16.mxu0 %v3107_v34  ;;  %1321 = vmatprep.mubr.bf16.mxu1 %v3107_v34  ;;  %3147 = vst [vmem:[#allocation7_spill] sm:$0xff] %v2652_v6  ;;  %3148 = vst [vmem:[#allocation8_spill] sm:$0xff] %v2655_v7 }
 0x346   :  { %1251 = vmatpush1.bf16.msra.mxu0 %v2273_v8  ;;  %1292 = vmatpush1.bf16.msra.mxu1 %v2276_v9  ;;  %v42_v8 = vld [vmem:[%s3011_s0 + $0x20] sm:$0xff]  ;;  %v3149_v9 = vmov 2  }
 0x347   :  { %1252 = vmatprep.subr.bf16.mxu0 %v2279_v10  ;;  %1293 = vmatprep.subr.bf16.mxu1 %v2281_v11  ;;  %v3150_v10 = vmov 3   ;;  %v124_v11 = vpop.permute.xlu1 %123 }
 0x348   :  { %265 = vperm.xlu1 %1949, %v42_v8   ;;  %128 = vperm.xlu0 %1948, %v42_v8   ;;  %v198_v54 = vmul.f32 %v2445_v46, %v124_v11 }
 0x34a   :  { %1253 = vmatpush1.bf16.msra.mxu0 %v2283_v12  ;;  %1294 = vmatpush1.bf16.msra.mxu1 %v2285_v13  ;;  %v3151_v12 = vld [vmem:[#allocation9_spill] sm:$0xff]  ;;  %v230_v60 = vadd.f32 %v198_v54, %v3164_v58 }
 0x34b   :  { %1254 = vmatprep.subr.bf16.mxu0 %v2289_v14  ;;  %1295 = vmatprep.subr.bf16.mxu1 %v2293_v15  ;;  %v196_v13 = vmul.f32 %v3151_v12, %v124_v11  ;;  %v3152_v14 = vld [vmem:[#allocation10_spill] sm:$0xff] }
 0x34c   :  { %1950 = vset.pattern.permute.xlu1 %v3149_v9  ;;  %1951 = vset.pattern.permute.xlu0 %v3150_v10  ;;  %v197_v15 = vmul.f32 %v3152_v14, %v124_v11 }
 0x34d   :  { %397 = vperm.xlu1 %1950, %v42_v8   ;;  %529 = vperm.xlu0 %1951, %v42_v8  }
 0x34e   :  { %1255 = vmatpush1.bf16.msra.mxu0 %v2295_v16  ;;  %1296 = vmatpush1.bf16.msra.mxu1 %v2299_v17  ;;  %v262_v16 = vpop.permute.xlu0 %261  ;;  %v394_v17 = vpop.permute.xlu1 %393 }
 0x34f   :  { %1256 = vmatprep.subr.bf16.mxu0 %v2301_v18  ;;  %1297 = vmatprep.subr.bf16.mxu1 %v2305_v19  ;;  %v3153_v18 = vld [vmem:[#allocation11_spill] sm:$0xff]  ;;  %v331_v59 = vmul.f32 %v3161_v0, %v262_v16  ;;  %v463_v45 = vmul.f32 %v3163_v53, %v394_v17  ;;  %v330_v50 = vmul.f32 %v2466_v52, %v262_v16 }
 0x350   :  { %v228_v19 = vadd.f32 %v196_v13, %v3153_v18 }
 0x351   :  { %1952 = vset.pattern.permute.xlu1 %v3107_v34  ;;  %1954 = vset.pattern.permute.xlu0 %v3149_v9 }
 0x352   :  { %1257 = vmatpush1.bf16.msra.mxu0 %v2307_v20  ;;  %1298 = vmatpush1.bf16.msra.mxu1 %v2309_v21  ;;  %v3154_v20 = vld [vmem:[#allocation12_spill] sm:$0xff] }
 0x353   :  { %1258 = vmatprep.subr.bf16.mxu0 %v2313_v22  ;;  %1299 = vmatprep.subr.bf16.mxu1 %v2317_v23  ;;  %v328_v21 = vmul.f32 %v3154_v20, %v262_v16  ;;  %v3155_v22 = vld [vmem:[#allocation13_spill] sm:$0xff] }
 0x354   :  { %v229_v23 = vadd.f32 %v197_v15, %v3155_v22  ;;  %v462_v15 = vmul.f32 %v2470_v51, %v394_v17 }
 0x356   :  { %1259 = vmatpush1.bf16.msra.mxu0 %v2321_v24  ;;  %1300 = vmatpush1.bf16.msra.mxu1 %v2323_v25  ;;  %v3156_v24 = vld [vmem:[#allocation14_spill] sm:$0xff] }
 0x357   :  { %1260 = vmatprep.subr.bf16.mxu0 %v2327_v26  ;;  %1301 = vmatprep.subr.bf16.mxu1 %v2329_v27  ;;  %v329_v25 = vmul.f32 %v3156_v24, %v262_v16  ;;  %v3157_v26 = vld [vmem:[#allocation15_spill] sm:$0xff] }
 0x358   :  { %v199_v27 = vmul.f32 %v3157_v26, %v124_v11 }
 0x35a   :  { %1261 = vmatpush1.bf16.msra.mxu0 %v2336_v29  ;;  %1302 = vmatpush1.bf16.msra.mxu1 %v2338_v30  ;;  %v3158_v29 = vld [vmem:[#allocation16_spill] sm:$0xff]  ;;  %v231_v38 = vadd.f32 %v199_v27, %v3160_v43 }
 0x35b   :  { %1262 = vmatprep.subr.bf16.mxu0 %v2342_v31  ;;  %1303 = vmatprep.subr.bf16.mxu1 %v2344_v32  ;;  %v460_v30 = vmul.f32 %v3158_v29, %v394_v17  ;;  %v360_v31 = vadd.f32 %v328_v21, %v228_v19  ;;  %v3159_v32 = vld [vmem:[#allocation17_spill] sm:$0xff]  ;;  %v362_v21 = vadd.f32 %v330_v50, %v230_v60 }
 0x35c   :  { %v461_v48 = vmul.f32 %v3159_v32, %v394_v17  ;;  %v363_v49 = vadd.f32 %v331_v59, %v231_v38 }
 0x35d   :  { %v492_v42 = vadd.f32 %v460_v30, %v360_v31  ;;  %v494_v30 = vadd.f32 %v462_v15, %v362_v21  ;;  %v2717_v15 = vld [vmem:[#allocation2 + $0x64] ss:$16 sps:$4 sm:$0xff]   ;;  %v2723_v21 = vld [vmem:[#allocation2 + $0x60] ss:$16 sps:$4 sm:$0xff]  }
 0x35e   :  { %1263 = vmatpush1.bf16.msra.mxu0 %v3126_v4  ;;  %1304 = vmatpush1.bf16.msra.mxu1 %v3127_v5  ;;  %v526_v4 = vpop.permute.xlu1 %525  ;;  %v361_v5 = vadd.f32 %v329_v25, %v229_v23  ;;  %v495_v39 = vadd.f32 %v463_v45, %v363_v49 }
 0x35f   :  { %1359 = vmatprep.subr.bf16.mxu0 %v2652_v6  ;;  %1400 = vmatprep.subr.bf16.mxu1 %v2655_v7  ;;  %v592_v35 = vmul.f32 %v2452_v36, %v526_v4  ;;  %v593_v57 = vmul.f32 %v3162_v44, %v526_v4  ;;  %v595_v8 = vmul.f32 %v2473_v2, %v526_v4 }
 0x360   :  { %v493_v56 = vadd.f32 %v461_v48, %v361_v5  ;;  %v594_v31 = vmul.f32 %v2480_v37, %v526_v4 }
 0x361   :  { %v624_v28 = vadd.f32 %v592_v35, %v492_v42  ;;  %v627_v27 = vadd.f32 %v595_v8, %v495_v39  ;;  %v2705_v39 = vld [vmem:[#allocation2 + $0x44] ss:$16 sps:$4 sm:$0xff]   ;;  %v2708_v8 = vld [vmem:[#allocation2 + $0x4c] ss:$16 sps:$4 sm:$0xff]  }
 0x362   :  { %v625_v63 = vadd.f32 %v593_v57, %v493_v56  ;;  %v626_v5 = vadd.f32 %v594_v31, %v494_v30  ;;  %v2738_v30 = vld [vmem:[#allocation2 + $0x88] ss:$16 sps:$4 sm:$0xff]   ;;  %v2741_v31 = vld [vmem:[#allocation2 + $0xa4] ss:$16 sps:$4 sm:$0xff]  }
 0x414   :  { %v1171_v62 = vpop.f32.mrb[12].mxu0  ;;  %v1212_v55 = vpop.f32.mrb[12].mxu1 }
 0x415   :  { %v1219_v1 = vadd.f32 %v1171_v62, %v624_v28  ;;  %v1173_v40 = vpop.f32.mrb[13].mxu0  ;;  %v1214_v47 = vpop.f32.mrb[13].mxu1  ;;  %v1221_v59 = vadd.f32 %v1212_v55, %v626_v5  ;;  %v2747_v5 = vld [vmem:[#allocation2 + $0xa0] ss:$16 sps:$4 sm:$0xff]  }
 0x416   :  { %v1220_v61 = vadd.f32 %v1173_v40, %v625_v63  ;;  %v1175_v11 = vpop.f32.mrb[14].mxu0  ;;  %v1216_v13 = vpop.f32.mrb[14].mxu1  ;;  %v1222_v48 = vadd.f32 %v1214_v47, %v627_v27  ;;  %v2691_v40 = vld [vmem:[#allocation2 + $0x24] ss:$16 sps:$4 sm:$0xff]   ;;  %v2698_v47 = vld [vmem:[#allocation2 + $0x20] ss:$16 sps:$4 sm:$0xff]  }
 0x417   :  { %v1831_v19 = vmul.f32 -1.442695, %v1219_v1  ;;  %v1176_v23 = vpop.f32.mrb[15].mxu0  ;;  %v1217_v25 = vpop.f32.mrb[15].mxu1  ;;  %v2711_v11 = vld [vmem:[#allocation2 + $0x40] ss:$16 sps:$4 sm:$0xff]  }
 0x418   :  { %v1832_v16 = vmul.f32 -1.442695, %v1220_v61  ;;  %v1833_v38 = vmul.f32 -1.442695, %v1222_v48  ;;  %v2702_v61 = vld [vmem:[#allocation2 + $0x28] ss:$16 sps:$4 sm:$0xff]  }
 0x419   :  { %2060 = vpow2.f32 %v1831_v19  ;;  %v2714_v13 = vld [vmem:[#allocation2 + $0x48] ss:$16 sps:$4 sm:$0xff]   ;;  %v2720_v19 = vld [vmem:[#allocation2 + $0x6c] ss:$16 sps:$4 sm:$0xff]   ;;  %v2729_v25 = vld [vmem:[#allocation2 + $0x84] ss:$16 sps:$4 sm:$0xff]  }
 0x41a   :  { %2062 = vpow2.f32 %v1832_v16  ;;  %v2726_v23 = vld [vmem:[#allocation2 + $0x68] ss:$16 sps:$4 sm:$0xff]   ;;  %v2732_v16 = vld [vmem:[#allocation2 + $0x8c] ss:$16 sps:$4 sm:$0xff]   ;;  %v2735_v27 = vld [vmem:[#allocation2 + $0x80] ss:$16 sps:$4 sm:$0xff]  }
 0x41b   :  { %2064 = vpow2.f32 %v1833_v38  ;;  %v2744_v48 = vld [vmem:[#allocation2 + $0xac] ss:$16 sps:$4 sm:$0xff]   ;;  %v2750_v38 = vld [vmem:[#allocation2 + $0xa8] ss:$16 sps:$4 sm:$0xff]  }
 0x41c   :  { %2066 = vtanh.f32 %v1221_v59  ;;  %v2753_v59 = vld [vmem:[#allocation2 + $0xc4] ss:$16 sps:$4 sm:$0xff]  }
 0x423   :  { %v2061_v54 = vpop.eup %2060 }
 0x424   :  { %v2063_v42 = vpop.eup %2062  ;;  %v1226_v35 = vadd.f32 1.0, %v2061_v54  ;;  %v2756_v54 = vld [vmem:[#allocation2 + $0xcc] ss:$16 sps:$4 sm:$0xff]  }
 0x425   :  { %v1232_v17 = vadd.f32 1.0, %v2063_v42  ;;  %v2065_v56 = vpop.eup %2064  ;;  %v2759_v42 = vld [vmem:[#allocation2 + $0xc0] ss:$16 sps:$4 sm:$0xff]  }
 0x426   :  { %2068 = vrcp.f32 %v1226_v35  ;;  %v2067_v57 = vpop.eup %2066  ;;  %v1239_v50 = vadd.f32 1.0, %v2065_v56  ;;  %v2762_v35 = vld [vmem:[#allocation2 + $0xc8] ss:$16 sps:$4 sm:$0xff]   ;;  %v2768_v56 = vld [vmem:[#allocation2 + $0xec] ss:$16 sps:$4 sm:$0xff]  }
 0x427   :  { %2070 = vrcp.f32 %v1232_v17  ;;  %v2765_v17 = vld [vmem:[#allocation2 + $0xe4] ss:$16 sps:$4 sm:$0xff]  }
 0x428   :  { %2072 = vrcp.f32 %v1239_v50  ;;  %v129_v50 = vpop.permute.xlu0 %128 }
 0x430   :  { %v2069_v45 = vpop.eup %2068 }
 0x431   :  { %v2071_v49 = vpop.eup %2070  ;;  %v1243_v60 = vmul.f32 %v2069_v45, %v2067_v57  ;;  %v2771_v57 = vld [vmem:[#allocation2 + $0xe0] ss:$16 sps:$4 sm:$0xff]   ;;  %v2774_v45 = vld [vmem:[#allocation2 + $0xe8] ss:$16 sps:$4 sm:$0xff]  }
 0x432   :  { %v1242_v4 = vmul.f32 %v2071_v49, %v2613_v33  ;;  %v2073_v62 = vpop.eup %2072  ;;  %v2694_v33 = vld [vmem:[#allocation2 + $0x2c] ss:$16 sps:$4 sm:$0xff]   ;;  %3165 = vst [vmem:[#allocation5_spill] sm:$0xff] %v2771_v57  ;;  %3166 = vst [vmem:[#allocation6_spill] sm:$0xff] %v2774_v45 }
 0x433   :  { %v43_v49 = vld [vmem:[%s3011_s0 + $0x28] sm:$0xff] }
 0x434   :  { %v2686_v28 = vadd.f32 %v1243_v60, %v1242_v4  ;;  %133 = vperm.xlu1 %1952, %v43_v49   ;;  %401 = vperm.xlu0 %1954, %v43_v49   ;;  %v3167_v60 = vmov 1   ;;  %v266_v4 = vpop.permute.xlu1 %265 }
 0x435   :  { %v333_v9 = vmul.f32 %v3156_v24, %v266_v4 }
 0x436   :  { %2074 = vtanh.f32 %v2686_v28 }
 0x438   :  { %1953 = vset.pattern.permute.xlu1 %v3167_v60  ;;  %1957 = vset.pattern.permute.xlu0 %v3167_v60 }
 0x439   :  { %269 = vperm.xlu1 %1953, %v43_v49  }
 0x43d   :  { %1955 = vset.pattern.permute.xlu1 %v3150_v10  ;;  %v203_v10 = vmul.f32 %v3157_v26, %v129_v50 }
 0x43e   :  { %533 = vperm.xlu1 %1955, %v43_v49  }
 0x440   :  { %v2075_v55 = vpop.eup %2074 }
 0x441   :  { %v1246_v63 = vmul.f32 %v2075_v55, %v2073_v62  ;;  %v200_v62 = vmul.f32 %v3151_v12, %v129_v50  ;;  %v201_v55 = vmul.f32 %v3152_v14, %v129_v50  ;;  %v335_v14 = vmul.f32 %v3161_v0, %v266_v4 }
 0x442   :  { %1956 = vset.pattern.permute.xlu1 %v3107_v34 }
 0x443   :  { %v1247_v1 = vpack.c.bf16 %v1246_v63, %v1246_v63  ;;  %v332_v63 = vmul.f32 %v3154_v20, %v266_v4  ;;  %v233_v60 = vadd.f32 %v201_v55, %v3155_v22  ;;  %v235_v20 = vadd.f32 %v203_v10, %v3160_v43 }
 0x445   :  { %1281 = vmatmul.mubr.bf16.vlgmr.msra.gmra.mrb[16].mxu0 %v1247_v1  ;;  %1322 = vmatmul.mubr.bf16.vlgmr.msra.gmra.mrb[16].mxu1 %v1247_v1  ;;  %v232_v1 = vadd.f32 %v200_v62, %v3153_v18  ;;  %v365_v12 = vadd.f32 %v333_v9, %v233_v60  ;;  %v202_v62 = vmul.f32 %v2445_v46, %v129_v50 }
 0x446   :  { %1360 = vmatpush1.bf16.msra.mxu0 %v2616_v3  ;;  %1401 = vmatpush1.bf16.msra.mxu1 %v2619_v41 }
 0x447   :  { %1361 = vmatprep.subr.bf16.mxu0 %v2691_v40  ;;  %1402 = vmatprep.subr.bf16.mxu1 %v2694_v33 }
 0x448   :  { %1391 = vmatprep.mubr.bf16.mxu0 %v3107_v34  ;;  %1432 = vmatprep.mubr.bf16.mxu1 %v3107_v34 }
 0x44a   :  { %1362 = vmatpush1.bf16.msra.mxu0 %v2698_v47  ;;  %1403 = vmatpush1.bf16.msra.mxu1 %v2702_v61 }
 0x44b   :  { %1363 = vmatprep.subr.bf16.mxu0 %v2705_v39  ;;  %1404 = vmatprep.subr.bf16.mxu1 %v2708_v8 }
 0x44e   :  { %1364 = vmatpush1.bf16.msra.mxu0 %v2711_v11  ;;  %1405 = vmatpush1.bf16.msra.mxu1 %v2714_v13 }
 0x44f   :  { %1365 = vmatprep.subr.bf16.mxu0 %v2717_v15  ;;  %1406 = vmatprep.subr.bf16.mxu1 %v2720_v19 }
 0x452   :  { %1366 = vmatpush1.bf16.msra.mxu0 %v2723_v21  ;;  %1407 = vmatpush1.bf16.msra.mxu1 %v2726_v23 }
 0x453   :  { %1367 = vmatprep.subr.bf16.mxu0 %v2729_v25  ;;  %1408 = vmatprep.subr.bf16.mxu1 %v2732_v16 }
 0x456   :  { %1368 = vmatpush1.bf16.msra.mxu0 %v2735_v27  ;;  %1409 = vmatpush1.bf16.msra.mxu1 %v2738_v30 }
 0x457   :  { %1369 = vmatprep.subr.bf16.mxu0 %v2741_v31  ;;  %1410 = vmatprep.subr.bf16.mxu1 %v2744_v48 }
 0x45a   :  { %1370 = vmatpush1.bf16.msra.mxu0 %v2747_v5  ;;  %1411 = vmatpush1.bf16.msra.mxu1 %v2750_v38 }
 0x45b   :  { %1371 = vmatprep.subr.bf16.mxu0 %v2753_v59  ;;  %1412 = vmatprep.subr.bf16.mxu1 %v2756_v54 }
 0x45e   :  { %1372 = vmatpush1.bf16.msra.mxu0 %v2759_v42  ;;  %1413 = vmatpush1.bf16.msra.mxu1 %v2762_v35 }
 0x45f   :  { %1373 = vmatprep.subr.bf16.mxu0 %v2765_v17  ;;  %1414 = vmatprep.subr.bf16.mxu1 %v2768_v56 }
 0x462   :  { %1374 = vmatpush1.bf16.msra.mxu0 %v2771_v57  ;;  %1415 = vmatpush1.bf16.msra.mxu1 %v2774_v45  ;;  %v530_v57 = vpop.permute.xlu0 %529 }
 0x463   :  { %1470 = vmatprep.subr.bf16.mxu0 %v2652_v6  ;;  %1511 = vmatprep.subr.bf16.mxu1 %v2655_v7  ;;  %v398_v7 = vpop.permute.xlu1 %397  ;;  %v364_v6 = vadd.f32 %v332_v63, %v232_v1  ;;  %v596_v24 = vmul.f32 %v2452_v36, %v530_v57  ;;  %v597_v22 = vmul.f32 %v3162_v44, %v530_v57 }
 0x464   :  { %v464_v49 = vmul.f32 %v3158_v29, %v398_v7  ;;  %v465_v45 = vmul.f32 %v3159_v32, %v398_v7  ;;  %v467_v26 = vmul.f32 %v3163_v53, %v398_v7  ;;  %v367_v29 = vadd.f32 %v335_v14, %v235_v20 }
 0x465   :  { %v334_v63 = vmul.f32 %v2466_v52, %v266_v4  ;;  %v234_v1 = vadd.f32 %v202_v62, %v3164_v58  ;;  %v466_v53 = vmul.f32 %v2470_v51, %v398_v7 }
 0x466   :  { %v496_v18 = vadd.f32 %v464_v49, %v364_v6  ;;  %v497_v55 = vadd.f32 %v465_v45, %v365_v12  ;;  %v499_v49 = vadd.f32 %v467_v26, %v367_v29  ;;  %v599_v12 = vmul.f32 %v2473_v2, %v530_v57 }
 0x467   :  { %v366_v20 = vadd.f32 %v334_v63, %v234_v1 }
 0x468   :  { %v628_v9 = vadd.f32 %v596_v24, %v496_v18  ;;  %v629_v32 = vadd.f32 %v597_v22, %v497_v55  ;;  %v631_v18 = vadd.f32 %v599_v12, %v499_v49  ;;  %v598_v24 = vmul.f32 %v2480_v37, %v530_v57 }
 0x469   :  { %v498_v22 = vadd.f32 %v466_v53, %v366_v20  ;;  %v3171_v20 = vld [vmem:[#allocation8_spill] sm:$0xff] }
 0x518   :  { %v1282_v60 = vpop.f32.mrb[16].mxu0  ;;  %v1323_v0 = vpop.f32.mrb[16].mxu1 }
 0x519   :  { %v1330_v10 = vadd.f32 %v1282_v60, %v628_v9  ;;  %v1284_v43 = vpop.f32.mrb[17].mxu0  ;;  %v1325_v50 = vpop.f32.mrb[17].mxu1 }
 0x51a   :  { %v1331_v6 = vadd.f32 %v1284_v43, %v629_v32  ;;  %v1286_v45 = vpop.f32.mrb[18].mxu0  ;;  %v1327_v44 = vpop.f32.mrb[18].mxu1  ;;  %v1333_v55 = vadd.f32 %v1325_v50, %v631_v18  ;;  %v630_v32 = vadd.f32 %v598_v24, %v498_v22  ;;  %v3173_v18 = vmov 3  }
 0x51b   :  { %v1834_v14 = vmul.f32 -1.442695, %v1330_v10  ;;  %v1287_v4 = vpop.f32.mrb[19].mxu0  ;;  %v1328_v52 = vpop.f32.mrb[19].mxu1  ;;  %v3169_v45 = vld [vmem:[#allocation6_spill] sm:$0xff]  ;;  %v3174_v22 = vmov 1  }
 0x51c   :  { %v1835_v62 = vmul.f32 -1.442695, %v1331_v6  ;;  %v1836_v26 = vmul.f32 -1.442695, %v1333_v55  ;;  %v1332_v29 = vadd.f32 %v1323_v0, %v630_v32  ;;  %v44_v4 = vld [vmem:[%s3011_s0 + $0x30] sm:$0xff]  ;;  %v134_v24 = vpop.permute.xlu1 %133  ;;  %v3175_v55 = vld [vmem:[#allocation9_spill] sm:$0xff] }
 0x51d   :  { %2076 = vpow2.f32 %v1834_v14  ;;  %v3170_v14 = vld [vmem:[#allocation7_spill] sm:$0xff]  ;;  %138 = vperm.xlu1 %1956, %v44_v4   ;;  %273 = vperm.xlu0 %1957, %v44_v4   ;;  %v204_v32 = vmul.f32 %v3175_v55, %v134_v24 }
 0x51e   :  { %2078 = vpow2.f32 %v1835_v62  ;;  %v3172_v62 = vmov 2  }
 0x51f   :  { %2080 = vpow2.f32 %v1836_v26  ;;  %v3176_v26 = vld [vmem:[#allocation10_spill] sm:$0xff] }
 0x520   :  { %2082 = vtanh.f32 %v1332_v29  ;;  %v205_v29 = vmul.f32 %v3176_v26, %v134_v24  ;;  %v3184_v26 = vld [vmem:[#allocation18_spill] sm:$0xff] }
 0x521   :  { %1958 = vset.pattern.permute.xlu1 %v3172_v62  ;;  %1960 = vset.pattern.permute.xlu0 %v3107_v34 }
 0x522   :  { %405 = vperm.xlu1 %1958, %v44_v4  }
 0x526   :  { %1959 = vset.pattern.permute.xlu1 %v3173_v18  ;;  %v3185_v18 = vld [vmem:[#allocation19_spill] sm:$0xff] }
 0x527   :  { %v2077_v43 = vpop.eup %2076  ;;  %537 = vperm.xlu1 %1959, %v44_v4  }
 0x528   :  { %v2079_v9 = vpop.eup %2078  ;;  %v1337_v44 = vadd.f32 1.0, %v2077_v43  ;;  %v270_v43 = vpop.permute.xlu1 %269 }
 0x529   :  { %v1343_v7 = vadd.f32 1.0, %v2079_v9  ;;  %v2081_v52 = vpop.eup %2080  ;;  %v3177_v9 = vld [vmem:[#allocation11_spill] sm:$0xff] }
 0x52a   :  { %2084 = vrcp.f32 %v1337_v44  ;;  %v2083_v63 = vpop.eup %2082  ;;  %v1350_v53 = vadd.f32 1.0, %v2081_v52  ;;  %v236_v44 = vadd.f32 %v204_v32, %v3177_v9  ;;  %v339_v32 = vmul.f32 %v3185_v18, %v270_v43 }
 0x52b   :  { %2086 = vrcp.f32 %v1343_v7  ;;  %1961 = vset.pattern.permute.xlu1 %v3174_v22  ;;  %v3178_v7 = vld [vmem:[#allocation12_spill] sm:$0xff] }
 0x52c   :  { %2088 = vrcp.f32 %v1350_v53  ;;  %v336_v52 = vmul.f32 %v3178_v7, %v270_v43  ;;  %v402_v53 = vpop.permute.xlu0 %401  ;;  %v534_v4 = vpop.permute.xlu1 %533  ;;  %v206_v7 = vmul.f32 %v2445_v46, %v134_v24 }
 0x534   :  { %v2085_v1 = vpop.eup %2084 }
 0x535   :  { %v2087_v60 = vpop.eup %2086  ;;  %v1354_v10 = vmul.f32 %v2085_v1, %v2083_v63  ;;  %v3179_v63 = vld [vmem:[#allocation13_spill] sm:$0xff] }
 0x536   :  { %v1353_v57 = vmul.f32 %v2087_v60, %v2686_v28  ;;  %v2089_v0 = vpop.eup %2088  ;;  %v3168_v28 = vld [vmem:[#allocation5_spill] sm:$0xff]  ;;  %v237_v1 = vadd.f32 %v205_v29, %v3179_v63  ;;  %v3180_v60 = vld [vmem:[#allocation14_spill] sm:$0xff]  ;;  %v600_v29 = vmul.f32 %v2452_v36, %v534_v4  ;;  %v3186_v63 = vld [vmem:[#allocation20_spill] sm:$0xff] }
 0x537   :  { %v601_v62 = vmul.f32 %v3186_v63, %v534_v4 }
 0x538   :  { %v2807_v50 = vadd.f32 %v1354_v10, %v1353_v57  ;;  %v337_v10 = vmul.f32 %v3180_v60, %v270_v43  ;;  %v3181_v57 = vld [vmem:[#allocation15_spill] sm:$0xff] }
 0x53a   :  { %2090 = vtanh.f32 %v2807_v50  ;;  %v369_v22 = vadd.f32 %v337_v10, %v237_v1 }
 0x544   :  { %v2091_v6 = vpop.eup %2090 }
 0x545   :  { %v1357_v49 = vmul.f32 %v2091_v6, %v2089_v0  ;;  %v207_v0 = vmul.f32 %v3181_v57, %v134_v24  ;;  %v3182_v6 = vld [vmem:[#allocation16_spill] sm:$0xff]  ;;  %v3187_v57 = vld [vmem:[#allocation22_spill] sm:$0xff] }
 0x547   :  { %v1358_v12 = vpack.c.bf16 %v1357_v49, %v1357_v49  ;;  %v468_v49 = vmul.f32 %v3182_v6, %v402_v53  ;;  %v239_v55 = vadd.f32 %v207_v0, %v3184_v26 }
 0x549   :  { %1392 = vmatmul.mubr.bf16.vlgmr.msra.gmra.mrb[20].mxu0 %v1358_v12  ;;  %1433 = vmatmul.mubr.bf16.vlgmr.msra.gmra.mrb[20].mxu1 %v1358_v12  ;;  %v368_v12 = vadd.f32 %v336_v52, %v236_v44  ;;  %v371_v6 = vadd.f32 %v339_v32, %v239_v55  ;;  %v238_v44 = vadd.f32 %v206_v7, %v3164_v58  ;;  %v3188_v52 = vld [vmem:[#allocation23_spill] sm:$0xff] }
 0x54a   :  { %1471 = vmatpush1.bf16.msra.mxu0 %v2616_v3  ;;  %1512 = vmatpush1.bf16.msra.mxu1 %v2619_v41 }
 0x54b   :  { %1472 = vmatprep.subr.bf16.mxu0 %v2691_v40  ;;  %1513 = vmatprep.subr.bf16.mxu1 %v2694_v33  ;;  %v500_v9 = vadd.f32 %v468_v49, %v368_v12 }
 0x54c   :  { %1502 = vmatprep.mubr.bf16.mxu0 %v3107_v34  ;;  %1543 = vmatprep.mubr.bf16.mxu1 %v3107_v34 }
 0x54d   :  { %v632_v1 = vadd.f32 %v600_v29, %v500_v9 }
 0x54e   :  { %1473 = vmatpush1.bf16.msra.mxu0 %v2698_v47  ;;  %1514 = vmatpush1.bf16.msra.mxu1 %v2702_v61 }
 0x54f   :  { %1474 = vmatprep.subr.bf16.mxu0 %v2705_v39  ;;  %1515 = vmatprep.subr.bf16.mxu1 %v2708_v8 }
 0x552   :  { %1475 = vmatpush1.bf16.msra.mxu0 %v2711_v11  ;;  %1516 = vmatpush1.bf16.msra.mxu1 %v2714_v13 }
 0x553   :  { %1476 = vmatprep.subr.bf16.mxu0 %v2717_v15  ;;  %1517 = vmatprep.subr.bf16.mxu1 %v2720_v19 }
 0x556   :  { %1477 = vmatpush1.bf16.msra.mxu0 %v2723_v21  ;;  %1518 = vmatpush1.bf16.msra.mxu1 %v2726_v23 }
 0x557   :  { %1478 = vmatprep.subr.bf16.mxu0 %v2729_v25  ;;  %1519 = vmatprep.subr.bf16.mxu1 %v2732_v16 }
 0x55a   :  { %1479 = vmatpush1.bf16.msra.mxu0 %v2735_v27  ;;  %1520 = vmatpush1.bf16.msra.mxu1 %v2738_v30 }
 0x55b   :  { %1480 = vmatprep.subr.bf16.mxu0 %v2741_v31  ;;  %1521 = vmatprep.subr.bf16.mxu1 %v2744_v48 }
 0x55e   :  { %1481 = vmatpush1.bf16.msra.mxu0 %v2747_v5  ;;  %1522 = vmatpush1.bf16.msra.mxu1 %v2750_v38 }
 0x55f   :  { %1482 = vmatprep.subr.bf16.mxu0 %v2753_v59  ;;  %1523 = vmatprep.subr.bf16.mxu1 %v2756_v54 }
 0x562   :  { %1483 = vmatpush1.bf16.msra.mxu0 %v2759_v42  ;;  %1524 = vmatpush1.bf16.msra.mxu1 %v2762_v35 }
 0x563   :  { %1484 = vmatprep.subr.bf16.mxu0 %v2765_v17  ;;  %1525 = vmatprep.subr.bf16.mxu1 %v2768_v56 }
 0x566   :  { %1485 = vmatpush1.bf16.msra.mxu0 %v3168_v28  ;;  %1526 = vmatpush1.bf16.msra.mxu1 %v3169_v45  ;;  %v471_v45 = vmul.f32 %v3187_v57, %v402_v53  ;;  %v470_v57 = vmul.f32 %v2470_v51, %v402_v53 }
 0x567   :  { %1581 = vmatprep.subr.bf16.mxu0 %v3170_v14  ;;  %1622 = vmatprep.subr.bf16.mxu1 %v3171_v20  ;;  %v3183_v14 = vld [vmem:[#allocation17_spill] sm:$0xff] }
 0x568   :  { %v469_v20 = vmul.f32 %v3183_v14, %v402_v53  ;;  %v338_v14 = vmul.f32 %v3188_v52, %v270_v43  ;;  %v503_v12 = vadd.f32 %v471_v45, %v371_v6 }
 0x56a   :  { %v501_v60 = vadd.f32 %v469_v20, %v369_v22  ;;  %v603_v20 = vmul.f32 %v2473_v2, %v534_v4  ;;  %v370_v32 = vadd.f32 %v338_v14, %v238_v44 }
 0x56c   :  { %v633_v26 = vadd.f32 %v601_v62, %v501_v60  ;;  %v635_v9 = vadd.f32 %v603_v20, %v503_v12  ;;  %v502_v62 = vadd.f32 %v470_v57, %v370_v32  ;;  %v602_v60 = vmul.f32 %v2480_v37, %v534_v4 }
 0x61c   :  { %v1393_v10 = vpop.f32.mrb[20].mxu0  ;;  %v1434_v0 = vpop.f32.mrb[20].mxu1 }
 0x61d   :  { %v1441_v18 = vadd.f32 %v1393_v10, %v632_v1  ;;  %v1395_v28 = vpop.f32.mrb[21].mxu0  ;;  %v1436_v24 = vpop.f32.mrb[21].mxu1 }
 0x61e   :  { %v1442_v49 = vadd.f32 %v1395_v28, %v633_v26  ;;  %v1397_v22 = vpop.f32.mrb[22].mxu0  ;;  %v1438_v63 = vpop.f32.mrb[22].mxu1  ;;  %v1444_v29 = vadd.f32 %v1436_v24, %v635_v9  ;;  %v634_v28 = vadd.f32 %v602_v60, %v502_v62  ;;  %v3204_v60 = vld [vmem:[#allocation20_spill] sm:$0xff] }
 0x61f   :  { %v1837_v55 = vmul.f32 -1.442695, %v1441_v18  ;;  %v1398_v7 = vpop.f32.mrb[23].mxu0  ;;  %v1439_v58 = vpop.f32.mrb[23].mxu1 }
 0x620   :  { %v1838_v43 = vmul.f32 -1.442695, %v1442_v49  ;;  %v1839_v45 = vmul.f32 -1.442695, %v1444_v29  ;;  %v1443_v26 = vadd.f32 %v1434_v0, %v634_v28  ;;  %v3205_v28 = vld [vmem:[#allocation22_spill] sm:$0xff] }
 0x621   :  { %2092 = vpow2.f32 %v1837_v55  ;;  %v3203_v55 = vld [vmem:[#allocation19_spill] sm:$0xff] }
 0x622   :  { %2094 = vpow2.f32 %v1838_v43 }
 0x623   :  { %2096 = vpow2.f32 %v1839_v45 }
 0x624   :  { %2098 = vtanh.f32 %v1443_v26 }
 0x62b   :  { %v2093_v6 = vpop.eup %2092 }
 0x62c   :  { %v2095_v1 = vpop.eup %2094  ;;  %v1448_v63 = vadd.f32 1.0, %v2093_v6  ;;  %v3206_v6 = vld [vmem:[#allocation21_spill] sm:$0xff] }
 0x62d   :  { %v1454_v18 = vadd.f32 1.0, %v2095_v1  ;;  %v2097_v58 = vpop.eup %2096 }
 0x62e   :  { %2100 = vrcp.f32 %v1448_v63  ;;  %v2099_v53 = vpop.eup %2098  ;;  %v1461_v57 = vadd.f32 1.0, %v2097_v58 }
 0x62f   :  { %2102 = vrcp.f32 %v1454_v18 }
 0x630   :  { %2104 = vrcp.f32 %v1461_v57 }
 0x638   :  { %v2101_v14 = vpop.eup %2100 }
 0x639   :  { %v2103_v44 = vpop.eup %2102  ;;  %v1465_v10 = vmul.f32 %v2101_v14, %v2099_v53 }
 0x63a   :  { %v1464_v4 = vmul.f32 %v2103_v44, %v2807_v50  ;;  %v2105_v0 = vpop.eup %2104  ;;  %v3202_v50 = vld [vmem:[#allocation18_spill] sm:$0xff] }
 0x63c   :  { %v2872_v24 = vadd.f32 %v1465_v10, %v1464_v4 }
 0x63e   :  { %2106 = vtanh.f32 %v2872_v24 }
 0x648   :  { %v2107_v49 = vpop.eup %2106 }
 0x649   :  { %v1468_v12 = vmul.f32 %v2107_v49, %v2105_v0 }
 0x64b   :  { %v1469_v20 = vpack.c.bf16 %v1468_v12, %v1468_v12 }
 0x64d   :  { %1503 = vmatmul.mubr.bf16.vlgmr.msra.gmra.mrb[24].mxu0 %v1469_v20  ;;  %1544 = vmatmul.mubr.bf16.vlgmr.msra.gmra.mrb[24].mxu1 %v1469_v20 }
 0x64e   :  { %1582 = vmatpush1.bf16.msra.mxu0 %v2616_v3  ;;  %1623 = vmatpush1.bf16.msra.mxu1 %v2619_v41  ;;  %v3190_v3 = vld [vmem:[#allocation6_spill] sm:$0xff]  ;;  %v45_v41 = vld [vmem:[%s3011_s0 + $0x38] sm:$0xff] }
 0x64f   :  { %1583 = vmatprep.subr.bf16.mxu0 %v2691_v40  ;;  %1624 = vmatprep.subr.bf16.mxu1 %v2694_v33  ;;  %v3191_v40 = vmov 2   ;;  %v3192_v33 = vmov 3  }
 0x650   :  { %1613 = vmatprep.mubr.bf16.mxu0 %v3107_v34  ;;  %1654 = vmatprep.mubr.bf16.mxu1 %v3107_v34  ;;  %v3189_v34 = vld [vmem:[#allocation5_spill] sm:$0xff] }
 0x651   :  { %277 = vperm.xlu1 %1961, %v45_v41   ;;  %143 = vperm.xlu0 %1960, %v45_v41  }
 0x652   :  { %1584 = vmatpush1.bf16.msra.mxu0 %v2698_v47  ;;  %1625 = vmatpush1.bf16.msra.mxu1 %v2702_v61  ;;  %v139_v47 = vpop.permute.xlu1 %138  ;;  %v3193_v61 = vld [vmem:[#allocation9_spill] sm:$0xff] }
 0x653   :  { %1585 = vmatprep.subr.bf16.mxu0 %v2705_v39  ;;  %1626 = vmatprep.subr.bf16.mxu1 %v2708_v8  ;;  %v208_v39 = vmul.f32 %v3193_v61, %v139_v47  ;;  %v3194_v8 = vld [vmem:[#allocation10_spill] sm:$0xff]  ;;  %v210_v7 = vmul.f32 %v2445_v46, %v139_v47 }
 0x655   :  { %1962 = vset.pattern.permute.xlu1 %v3191_v40  ;;  %1963 = vset.pattern.permute.xlu0 %v3192_v33  ;;  %v242_v1 = vadd.f32 %v210_v7, %v3206_v6 }
 0x656   :  { %1586 = vmatpush1.bf16.msra.mxu0 %v2711_v11  ;;  %1627 = vmatpush1.bf16.msra.mxu1 %v2714_v13  ;;  %v209_v11 = vmul.f32 %v3194_v8, %v139_v47  ;;  %v274_v13 = vpop.permute.xlu0 %273 }
 0x657   :  { %1587 = vmatprep.subr.bf16.mxu0 %v2717_v15  ;;  %1628 = vmatprep.subr.bf16.mxu1 %v2720_v19  ;;  %v406_v15 = vpop.permute.xlu1 %405  ;;  %v3195_v19 = vld [vmem:[#allocation11_spill] sm:$0xff]  ;;  %v343_v32 = vmul.f32 %v3203_v55, %v274_v13  ;;  %v342_v63 = vmul.f32 %v3188_v52, %v274_v13 }
 0x658   :  { %409 = vperm.xlu1 %1962, %v45_v41   ;;  %541 = vperm.xlu0 %1963, %v45_v41   ;;  %v475_v45 = vmul.f32 %v3205_v28, %v406_v15 }
 0x659   :  { %v374_v41 = vadd.f32 %v342_v63, %v242_v1  ;;  %v1691_v1 = vld [vmem:[%s3015_s4] sm:$0xff]  ;;  %v1692_v63 = vld [vmem:[%s3015_s4 + $0x8] sm:$0xff] }
 0x65a   :  { %1588 = vmatpush1.bf16.msra.mxu0 %v2723_v21  ;;  %1629 = vmatpush1.bf16.msra.mxu1 %v2726_v23  ;;  %v240_v21 = vadd.f32 %v208_v39, %v3195_v19  ;;  %v3196_v23 = vld [vmem:[#allocation12_spill] sm:$0xff] }
 0x65b   :  { %1589 = vmatprep.subr.bf16.mxu0 %v2729_v25  ;;  %1630 = vmatprep.subr.bf16.mxu1 %v2732_v16  ;;  %v340_v25 = vmul.f32 %v3196_v23, %v274_v13  ;;  %v3197_v16 = vld [vmem:[#allocation13_spill] sm:$0xff] }
 0x65e   :  { %1590 = vmatpush1.bf16.msra.mxu0 %v2735_v27  ;;  %1631 = vmatpush1.bf16.msra.mxu1 %v2738_v30  ;;  %v241_v27 = vadd.f32 %v209_v11, %v3197_v16  ;;  %v3198_v30 = vld [vmem:[#allocation14_spill] sm:$0xff] }
 0x65f   :  { %1591 = vmatprep.subr.bf16.mxu0 %v2741_v31  ;;  %1632 = vmatprep.subr.bf16.mxu1 %v2744_v48  ;;  %v341_v31 = vmul.f32 %v3198_v30, %v274_v13  ;;  %v3199_v48 = vld [vmem:[#allocation15_spill] sm:$0xff] }
 0x662   :  { %1592 = vmatpush1.bf16.msra.mxu0 %v2747_v5  ;;  %1633 = vmatpush1.bf16.msra.mxu1 %v2750_v38  ;;  %v211_v5 = vmul.f32 %v3199_v48, %v139_v47  ;;  %v3200_v38 = vld [vmem:[#allocation16_spill] sm:$0xff] }
 0x663   :  { %1593 = vmatprep.subr.bf16.mxu0 %v2753_v59  ;;  %1634 = vmatprep.subr.bf16.mxu1 %v2756_v54  ;;  %v472_v59 = vmul.f32 %v3200_v38, %v406_v15  ;;  %v372_v54 = vadd.f32 %v340_v25, %v240_v21 }
 0x664   :  { %v243_v22 = vadd.f32 %v211_v5, %v3202_v50 }
 0x665   :  { %v504_v43 = vadd.f32 %v472_v59, %v372_v54 }
 0x666   :  { %1594 = vmatpush1.bf16.msra.mxu0 %v2759_v42  ;;  %1635 = vmatpush1.bf16.msra.mxu1 %v2762_v35  ;;  %v3201_v42 = vld [vmem:[#allocation17_spill] sm:$0xff]  ;;  %v375_v26 = vadd.f32 %v343_v32, %v243_v22 }
 0x667   :  { %1595 = vmatprep.subr.bf16.mxu0 %v2765_v17  ;;  %1636 = vmatprep.subr.bf16.mxu1 %v2768_v56  ;;  %v473_v35 = vmul.f32 %v3201_v42, %v406_v15  ;;  %v538_v17 = vpop.permute.xlu1 %537  ;;  %v373_v56 = vadd.f32 %v341_v31, %v241_v27 }
 0x668   :  { %v604_v9 = vmul.f32 %v2452_v36, %v538_v17  ;;  %v605_v29 = vmul.f32 %v3204_v60, %v538_v17  ;;  %v507_v0 = vadd.f32 %v475_v45, %v375_v26  ;;  %v607_v49 = vmul.f32 %v2473_v2, %v538_v17 }
 0x669   :  { %v505_v62 = vadd.f32 %v473_v35, %v373_v56  ;;  %v606_v13 = vmul.f32 %v2480_v37, %v538_v17 }
 0x66a   :  { %1596 = vmatpush1.bf16.msra.mxu0 %v3189_v34  ;;  %1637 = vmatpush1.bf16.msra.mxu1 %v3190_v3  ;;  %v636_v18 = vadd.f32 %v604_v9, %v504_v43  ;;  %v474_v34 = vmul.f32 %v2470_v51, %v406_v15  ;;  %v639_v39 = vadd.f32 %v607_v49, %v507_v0  ;;  %v1698_v0 = vld [vmem:[%s3015_s4 + $0x38] sm:$0xff] }
 0x66b   :  { %v637_v14 = vadd.f32 %v605_v29, %v505_v62 }
 0x66c   :  { %v506_v11 = vadd.f32 %v474_v34, %v374_v41  ;;  %v1702_v41 = vld [vmem:[%s3015_s4 + $0x58] sm:$0xff] }
 0x66e   :  { %v638_v25 = vadd.f32 %v606_v13, %v506_v11  ;;  %v1705_v13 = vld [vmem:[%s3015_s4 + $0x70] sm:$0xff] }
 0x720   :  { %v1504_v58 = vpop.f32.mrb[24].mxu0  ;;  %v1545_v53 = vpop.f32.mrb[24].mxu1 }
 0x721   :  { %v1552_v44 = vadd.f32 %v1504_v58, %v636_v18  ;;  %v1506_v10 = vpop.f32.mrb[25].mxu0  ;;  %v1547_v57 = vpop.f32.mrb[25].mxu1  ;;  %v1554_v31 = vadd.f32 %v1545_v53, %v638_v25  ;;  %v2203_v18 = vmov 0.0|0.0   ;;  %v1693_v58 = vld [vmem:[%s3015_s4 + $0x10] sm:$0xff]  ;;  %v1694_v53 = vld [vmem:[%s3015_s4 + $0x18] sm:$0xff] }
 0x722   :  { %v1553_v4 = vadd.f32 %v1506_v10, %v637_v14  ;;  %v1508_v12 = vpop.f32.mrb[26].mxu0  ;;  %v1549_v20 = vpop.f32.mrb[26].mxu1  ;;  %v1555_v21 = vadd.f32 %v1547_v57, %v639_v39  ;;  %1899 = vmatprep.subr.bf16.mxu0 %v2203_v18  ;;  %v1903_v14 = vpack.c.bf16 %v1694_v53, %v1693_v58  ;;  %v1696_v10 = vld [vmem:[%s3015_s4 + $0x28] sm:$0xff]  ;;  %v2205_v39 = vmov 0.0  }
 0x723   :  { %v1840_v3 = vmul.f32 -1.442695, %v1552_v44  ;;  %v1509_v40 = vpop.f32.mrb[27].mxu0  ;;  %v1550_v33 = vpop.f32.mrb[27].mxu1  ;;  %v1695_v44 = vld [vmem:[%s3015_s4 + $0x20] sm:$0xff]  ;;  %v1700_v20 = vld [vmem:[%s3015_s4 + $0x48] sm:$0xff] }
 0x724   :  { %v1841_v47 = vmul.f32 -1.442695, %v1553_v4  ;;  %v1842_v27 = vmul.f32 -1.442695, %v1555_v21  ;;  %v1906_v57 = vpack.c.bf16 %v1696_v10, %v1695_v44  ;;  %v1697_v4 = vld [vmem:[%s3015_s4 + $0x30] sm:$0xff]  ;;  %v1699_v12 = vld [vmem:[%s3015_s4 + $0x40] sm:$0xff] }
 0x725   :  { %2108 = vpow2.f32 %v1840_v3  ;;  %v1909_v49 = vpack.c.bf16 %v1698_v0, %v1697_v4  ;;  %v1912_v34 = vpack.c.bf16 %v1700_v20, %v1699_v12  ;;  %v1701_v3 = vld [vmem:[%s3015_s4 + $0x50] sm:$0xff]  ;;  %v1703_v40 = vld [vmem:[%s3015_s4 + $0x60] sm:$0xff]  ;;  %v1706_v21 = vld [vmem:[%s3015_s4 + $0x78] sm:$0xff] }
 0x726   :  { %2110 = vpow2.f32 %v1841_v47  ;;  %v1915_v33 = vpack.c.bf16 %v1702_v41, %v1701_v3  ;;  %v1704_v47 = vld [vmem:[%s3015_s4 + $0x68] sm:$0xff]  ;;  %v1921_v25 = vpack.c.bf16 %v1706_v21, %v1705_v13 }
 0x727   :  { %2112 = vpow2.f32 %v1842_v27  ;;  %v1918_v11 = vpack.c.bf16 %v1704_v47, %v1703_v40  ;;  %v144_v27 = vpop.permute.xlu0 %143 }
 0x728   :  { %2114 = vtanh.f32 %v1554_v31  ;;  %v278_v31 = vpop.permute.xlu1 %277 }
 0x72f   :  { %v2109_v5 = vpop.eup %2108 }
 0x730   :  { %v2111_v59 = vpop.eup %2110  ;;  %v1559_v54 = vadd.f32 1.0, %v2109_v5  ;;  %v212_v5 = vmul.f32 %v3193_v61, %v144_v27 }
 0x731   :  { %v1565_v15 = vadd.f32 1.0, %v2111_v59  ;;  %v2113_v35 = vpop.eup %2112  ;;  %v213_v59 = vmul.f32 %v3194_v8, %v144_v27  ;;  %v347_v8 = vmul.f32 %v3203_v55, %v278_v31 }
 0x732   :  { %2116 = vrcp.f32 %v1559_v54  ;;  %v2115_v56 = vpop.eup %2114  ;;  %v1572_v43 = vadd.f32 1.0, %v2113_v35  ;;  %v344_v54 = vmul.f32 %v3196_v23, %v278_v31  ;;  %v345_v35 = vmul.f32 %v3198_v30, %v278_v31 }
 0x733   :  { %2118 = vrcp.f32 %v1565_v15  ;;  %v244_v15 = vadd.f32 %v212_v5, %v3195_v19  ;;  %v214_v19 = vmul.f32 %v2445_v46, %v144_v27 }
 0x734   :  { %2120 = vrcp.f32 %v1572_v43 }
 0x735   :  { %v376_v43 = vadd.f32 %v344_v54, %v244_v15 }
 0x73c   :  { %v2117_v22 = vpop.eup %2116 }
 0x73d   :  { %v2119_v32 = vpop.eup %2118  ;;  %v1576_v7 = vmul.f32 %v2117_v22, %v2115_v56  ;;  %v245_v56 = vadd.f32 %v213_v59, %v3197_v16  ;;  %v410_v22 = vpop.permute.xlu1 %409  ;;  %v1846_v59 = vld [vmem:[%s3016_s5] ss:$0 sm:$0xff] }
 0x73e   :  { %v1575_v17 = vmul.f32 %v2119_v32, %v2872_v24  ;;  %v2121_v62 = vpop.eup %2120  ;;  %v1900_v24 = vpack.c.bf16 %v1692_v63, %v1691_v1  ;;  %v215_v32 = vmul.f32 %v3199_v48, %v144_v27  ;;  %v479_v48 = vmul.f32 %v3205_v28, %v410_v22 }
 0x73f   :  { %v377_v61 = vadd.f32 %v345_v35, %v245_v56  ;;  %v478_v28 = vmul.f32 %v2470_v51, %v410_v22 }
 0x740   :  { %v2933_v9 = vadd.f32 %v1576_v7, %v1575_v17  ;;  %v476_v7 = vmul.f32 %v3200_v38, %v410_v22  ;;  %v477_v17 = vmul.f32 %v3201_v42, %v410_v22  ;;  %v247_v23 = vadd.f32 %v215_v32, %v3202_v50 }
 0x741   :  { %v246_v42 = vadd.f32 %v214_v19, %v3206_v6 }
 0x742   :  { %2122 = vtanh.f32 %v2933_v9  ;;  %v379_v38 = vadd.f32 %v347_v8, %v247_v23 }
 0x744   :  { %v511_v53 = vadd.f32 %v479_v48, %v379_v38 }
 0x74c   :  { %v2123_v29 = vpop.eup %2122 }
 0x74d   :  { %v1579_v45 = vmul.f32 %v2123_v29, %v2121_v62  ;;  %v542_v62 = vpop.permute.xlu0 %541  ;;  %v508_v29 = vadd.f32 %v476_v7, %v376_v43 }
 0x74e   :  { %v608_v30 = vmul.f32 %v2452_v36, %v542_v62  ;;  %v609_v16 = vmul.f32 %v3204_v60, %v542_v62  ;;  %v611_v36 = vmul.f32 %v2473_v2, %v542_v62  ;;  %v610_v0 = vmul.f32 %v2480_v37, %v542_v62 }
 0x74f   :  { %v1580_v26 = vpack.c.bf16 %v1579_v45, %v1579_v45  ;;  %v509_v45 = vadd.f32 %v477_v17, %v377_v61 }
 0x750   :  { %v640_v1 = vadd.f32 %v608_v30, %v508_v29  ;;  %v643_v4 = vadd.f32 %v611_v36, %v511_v53 }
 0x751   :  { %1614 = vmatmul.mubr.bf16.vlgmr.msra.gmra.mrb[28].mxu0 %v1580_v26  ;;  %1655 = vmatmul.mubr.bf16.vlgmr.msra.gmra.mrb[28].mxu1 %v1580_v26  ;;  %v346_v26 = vmul.f32 %v3188_v52, %v278_v31 }
 0x752   :  { %1901 = vmatpush3.bf16.msra.mxu0 %v1900_v24  ;;  %1896 = vmatprep.mubr.msk.f32.mxu0 %vm2204_vm0, %v2205_v39  ;;  %v641_v24 = vadd.f32 %v609_v16, %v509_v45 }
 0x753   :  { %1902 = vmatprep.subr.bf16.mxu0 %v2203_v18  ;;  %v378_v10 = vadd.f32 %v346_v26, %v246_v42 }
 0x756   :  { %1904 = vmatpush3.bf16.msra.mxu0 %v1903_v14 }
 0x757   :  { %1905 = vmatprep.subr.bf16.mxu0 %v2203_v18 }
 0x75a   :  { %1907 = vmatpush3.bf16.msra.mxu0 %v1906_v57 }
 0x75b   :  { %1908 = vmatprep.subr.bf16.mxu0 %v2203_v18 }
 0x75e   :  { %1910 = vmatpush3.bf16.msra.mxu0 %v1909_v49  ;;  %v510_v49 = vadd.f32 %v478_v28, %v378_v10 }
 0x75f   :  { %1911 = vmatprep.subr.bf16.mxu0 %v2203_v18 }
 0x760   :  { %v642_v20 = vadd.f32 %v610_v0, %v510_v49 }
 0x762   :  { %1913 = vmatpush3.bf16.msra.mxu0 %v1912_v34 }
 0x763   :  { %1914 = vmatprep.subr.bf16.mxu0 %v2203_v18 }
 0x766   :  { %1916 = vmatpush3.bf16.msra.mxu0 %v1915_v33 }
 0x767   :  { %1917 = vmatprep.subr.bf16.mxu0 %v2203_v18 }
 0x76a   :  { %1919 = vmatpush3.bf16.msra.mxu0 %v1918_v11 }
 0x76b   :  { %1920 = vmatprep.subr.bf16.mxu0 %v2203_v18 }
 0x76e   :  { %1922 = vmatpush3.bf16.msra.mxu0 %v1921_v25 }
 0x824   :  { %v1615_v63 = vpop.f32.mrb[28].mxu0  ;;  %v1656_v55 = vpop.f32.mrb[28].mxu1 }
 0x825   :  { %v1663_v50 = vadd.f32 %v1615_v63, %v640_v1  ;;  %v1617_v18 = vpop.f32.mrb[29].mxu0  ;;  %v1658_v46 = vpop.f32.mrb[29].mxu1  ;;  %v1665_v34 = vadd.f32 %v1656_v55, %v642_v20 }
 0x826   :  { %v1664_v58 = vadd.f32 %v1617_v18, %v641_v24  ;;  %v1619_v60 = vpop.f32.mrb[30].mxu0  ;;  %v1660_v14 = vpop.f32.mrb[30].mxu1  ;;  %v1666_v12 = vadd.f32 %v1658_v46, %v643_v4 }
 0x827   :  { %v1843_v44 = vmul.f32 -1.442695, %v1663_v50  ;;  %v1620_v52 = vpop.f32.mrb[31].mxu0  ;;  %v1661_v57 = vpop.f32.mrb[31].mxu1 }
 0x828   :  { %v1844_v6 = vmul.f32 -1.442695, %v1664_v58  ;;  %v1845_v2 = vmul.f32 -1.442695, %v1666_v12 }
 0x829   :  { %2124 = vpow2.f32 %v1843_v44 }
 0x82a   :  { %2126 = vpow2.f32 %v1844_v6 }
 0x82b   :  { %2128 = vpow2.f32 %v1845_v2 }
 0x82c   :  { %2130 = vtanh.f32 %v1665_v34 }
 0x833   :  { %v2125_v3 = vpop.eup %2124 }
 0x834   :  { %v2127_v41 = vpop.eup %2126  ;;  %v1670_v40 = vadd.f32 1.0, %v2125_v3 }
 0x835   :  { %v1676_v51 = vadd.f32 1.0, %v2127_v41  ;;  %v2129_v33 = vpop.eup %2128 }
 0x836   :  { %2132 = vrcp.f32 %v1670_v40  ;;  %v2131_v47 = vpop.eup %2130  ;;  %v1683_v21 = vadd.f32 1.0, %v2129_v33 }
 0x837   :  { %2134 = vrcp.f32 %v1676_v51 }
 0x838   :  { %2136 = vrcp.f32 %v1683_v21 }
 0x840   :  { %v2133_v39 = vpop.eup %2132 }
 0x841   :  { %v2135_v11 = vpop.eup %2134  ;;  %v1687_v13 = vmul.f32 %v2133_v39, %v2131_v47 }
 0x842   :  { %v1686_v37 = vmul.f32 %v2135_v11, %v2933_v9  ;;  %v2137_v27 = vpop.eup %2136 }
 0x844   :  { %v1688_v25 = vadd.f32 %v1687_v13, %v1686_v37 }
 0x846   :  { %2138 = vtanh.f32 %v1688_v25 }
 0x850   :  { %v2139_v31 = vpop.eup %2138 }
 0x851   :  { %v1690_v5 = vmul.f32 %v2139_v31, %v2137_v27 }
 0x853   :  { %1897 = vmatmul.mubr.f32.vlgmr.msra.gmra.mrb[32].mxu0 %v1690_v5 }
 0x926   :  { %v1780_v54 = vpop.f32.mrb[32].mxu0 }
 0x927   :  { %v1781_v15 = vadd.f32 %v1846_v59, %v1780_v54  ;;  %v1898_v35 = vpop.f32.mrb[33].mxu0 }
 0x929   :  { %1784 = vst [vmem:[%s3017_s6] sm:$0xff] %v1781_v15 }
 0x92a   :  { %1789 = vsyncpa [#allocation3], 1 }

</bundles_post_ra>
